<compile_context>
chip_gen: v7x
topology: tpu7x:2x2x1
jax: 0.10.0
libtpu: 0.0.40
codegen_flags: <defaults>
</compile_context>

<pallas_src>
import jax
import jax.numpy as jnp
from jax.experimental import pallas as pl
from jax.experimental.pallas import tpu as pltpu


# ----------------------------------------------------------------------------
# environment.acceleration_u is environment-specific and not given; we use a
# fixed deterministic surrogate so the kernel is self-contained.
# TODO(synk): replace with the real environment.acceleration_u formula.
G1 = 0.5
G2 = 0.25


def _acceleration_u(u1, u2, cdelta, sdelta):
    au1 = G1 * u1 + G2 * cdelta * u2
    au2 = G1 * u2 + G2 * (cdelta * u1 - sdelta * u2)
    return au1, au2


# ----------------------------------------------------------------------------
# Flat parameter layout in SMEM (PyTorch (out, in) weights, row-major):
#   w1: (8, 6) -> [  0,  48)      b1: (8,) -> [ 48,  56)
#   w2: (8, 8) -> [ 56, 120)      b2: (8,) -> [120, 128)
#   w3: (2, 8) -> [128, 144)      b3: (2,) -> [144, 146)
W1_OFF, B1_OFF = 0, 48
W2_OFF, B2_OFF = 56, 120
W3_OFF, B3_OFF = 128, 144
N_PARAMS = 146

CHUNK_ROWS = 8          # one (8, 128) vreg per temporary -> no spills


# ----------------------------------------------------------------------------
def _make_kernel(block_rows: int):
    n_chunks = block_rows // CHUNK_ROWS

    def kernel(p_ref, z_ref, out_ref):
        # p_ref:   (146,)                f32 SMEM   (whole net, resident)
        # z_ref:   (6, block_rows, 128)  f32 VMEM
        # out_ref: (4, block_rows, 128)  f32 VMEM

        @pl.loop(0, n_chunks)
        def _(c):
            r0 = pl.multiple_of(c * CHUNK_ROWS, CHUNK_ROWS)
            rs = pl.ds(r0, CHUNK_ROWS)

            phi1   = z_ref[0, rs, :]
            d_phi1 = z_ref[1, rs, :]
            phi2   = z_ref[2, rs, :]
            d_phi2 = z_ref[3, rs, :]
            u1     = z_ref[4, rs, :]
            u2     = z_ref[5, rs, :]

            cphi1, sphi1 = jnp.cos(phi1), jnp.sin(phi1)
            cphi2, sphi2 = jnp.cos(phi2), jnp.sin(phi2)

            # Angle-difference trig and control acceleration are computed
            # up-front so only (au1, au2, d_phi1, d_phi2) persist across the
            # unrolled MLP -> small live vreg set.
            cdelta = cphi1 * cphi2 + sphi1 * sphi2
            sdelta = sphi1 * cphi2 - sphi2 * cphi1
            au1, au2 = _acceleration_u(u1, u2, cdelta, sdelta)

            # obs is never materialized/concatenated: the first layer is
            # unrolled directly over the 6 dense feature slabs.
            feats = (cphi1, sphi1, cphi2, sphi2, d_phi1, d_phi2)

            def linear(inputs, w_off, b_off, n_in, n_out, act):
                outs = []
                for j in range(n_out):
                    acc = inputs[0] * p_ref[w_off + j * n_in]
                    for k in range(1, n_in):
                        acc = acc + inputs[k] * p_ref[w_off + j * n_in + k]
                    acc = acc + p_ref[b_off + j]
                    outs.append(jnp.tanh(acc) if act else acc)
                return outs

            h1 = linear(feats, W1_OFF, B1_OFF, 6, 8, act=True)
            h2 = linear(h1, W2_OFF, B2_OFF, 8, 8, act=True)
            pred = linear(h2, W3_OFF, B3_OFF, 8, 2, act=False)  # 2 x (8, 128)

            # x_dot rows = (d_phi1, dd_phi1, d_phi2, dd_phi2): four dense,
            # unmasked (8, 128) stores.
            out_ref[0, rs, :] = d_phi1
            out_ref[1, rs, :] = au1 + pred[0]
            out_ref[2, rs, :] = d_phi2
            out_ref[3, rs, :] = au2 + pred[1]

    return kernel


# ----------------------------------------------------------------------------
def neural_a_forward(z, params, *, block_rows=512):
    """z: (B, 6) f32.  params: PyTorch-style (w1, b1, w2, b2, w3, b3).

    block_rows = rows of 128 lanes per grid step (multiple of 8).  Default 512
    (~64K batch elements / ~2.5 MiB per step, ~5 MiB double-buffered) fits all
    generations' default scoped VMEM; keep it small enough that the grid has
    >= 2 steps so v7x can use both TensorCores.
    """
    w1, b1, w2, b2, w3, b3 = params
    params_flat = jnp.concatenate(
        [w1.reshape(-1), b1.reshape(-1),
         w2.reshape(-1), b2.reshape(-1),
         w3.reshape(-1), b3.reshape(-1)]).astype(jnp.float32)
    assert params_flat.shape[0] == N_PARAMS

    block_rows = max(CHUNK_ROWS, (block_rows // CHUNK_ROWS) * CHUNK_ROWS)

    B = z.shape[0]
    rows = pl.cdiv(B, 128)                       # lanes hold the batch
    n_blocks = pl.cdiv(rows, block_rows)
    rows_p = n_blocks * block_rows
    Bp = rows_p * 128

    # Layout plumbing (kept out of the kernel): (B, 6) -> (6, rows_p, 128).
    # For end-to-end performance, keep data in this layout between kernels.
    z_t = jnp.transpose(z.astype(jnp.float32))   # (6, B): batch -> lanes
    if Bp != B:
        z_t = jnp.pad(z_t, ((0, 0), (0, Bp - B)))
    z_3d = z_t.reshape(6, rows_p, 128)

    out_3d = pl.pallas_call(
        _make_kernel(block_rows),
        out_shape=jax.ShapeDtypeStruct((4, rows_p, 128), jnp.float32),
        grid=(n_blocks,),
        in_specs=[
            pl.BlockSpec(memory_space=pltpu.MemorySpace.SMEM),   # params, resident
            pl.BlockSpec((6, block_rows, 128), lambda i: (0, i, 0)),
        ],
        out_specs=pl.BlockSpec((4, block_rows, 128), lambda i: (0, i, 0)),
        compiler_params=pltpu.CompilerParams(
            dimension_semantics=("parallel",)),
    )(params_flat, z_3d)

    out_t = out_3d.reshape(4, Bp)[:, :B]
    return jnp.transpose(out_t)                  # back to (B, 4)


# ----------------------------------------------------------------------------
def init_params(key):
    """Deterministic PyTorch-layout params: Linear(6,8), Linear(8,8), Linear(8,2).

    Weights are (out, in); biases are 1-D (out,).  Forward does x @ W.T + b.
    """
    k1, k2, k3, k4, k5, k6 = jax.random.split(key, 6)
    w1 = jax.random.normal(k1, (8, 6), jnp.float32) * 0.3
    b1 = jax.random.normal(k2, (8,), jnp.float32) * 0.1
    w2 = jax.random.normal(k3, (8, 8), jnp.float32) * 0.3
    b2 = jax.random.normal(k4, (8,), jnp.float32) * 0.1
    w3 = jax.random.normal(k5, (2, 8), jnp.float32) * 0.3
    b3 = jax.random.normal(k6, (2,), jnp.float32) * 0.1
    return (w1, b1, w2, b2, w3, b3)


# Pure-JAX reference for a correctness sanity check.
def neural_a_reference(z, params):
    w1, b1, w2, b2, w3, b3 = params
    phi1, d_phi1, phi2, d_phi2, u1, u2 = [z[:, i:i + 1] for i in range(6)]
    cphi1, sphi1 = jnp.cos(phi1), jnp.sin(phi1)
    cphi2, sphi2 = jnp.cos(phi2), jnp.sin(phi2)
    obs = jnp.concatenate([cphi1, sphi1, cphi2, sphi2, d_phi1, d_phi2], axis=1)
    h1 = jnp.tanh(obs @ w1.T + b1)
    h2 = jnp.tanh(h1 @ w2.T + b2)
    pred = h2 @ w3.T + b3
    cdelta = cphi1 * cphi2 + sphi1 * sphi2
    sdelta = sphi1 * cphi2 - sphi2 * cphi1
    au1, au2 = _acceleration_u(u1, u2, cdelta, sdelta)
    dd = jnp.concatenate([au1, au2], axis=1) + pred
    return jnp.concatenate([d_phi1, dd[:, 0:1], d_phi2, dd[:, 1:2]], axis=1)


if __name__ == "__main__":
    key = jax.random.PRNGKey(0)
    kz, kp = jax.random.split(key)

    # Small test: 4096 batch elements -> 32 rows of 128 lanes; block_rows=8
    # gives a 4-step grid (exercises double-buffered pipelining + megacore
    # sharding) with dense (8, 128) chunks inside the kernel.
    B = 4096
    z = jax.random.normal(kz, (B, 6), jnp.float32)  # (phi1,dphi1,phi2,dphi2,u1,u2)
    params = init_params(kp)

    out = neural_a_forward(z, params, block_rows=8)
    out = jax.block_until_ready(out)

    ref = neural_a_reference(z, params)
    assert out.shape == (B, 4)
    assert jnp.allclose(out, ref, atol=1e-4, rtol=1e-5)

    print("KERNEL_OK")
</pallas_src>

<mosaic_0001>
module attributes {stable_mosaic.version = 11 : i64} {
  func.func @kernel(%arg0: i32, %arg1: memref<146xf32, #tpu.memory_space<smem>>, %arg2: memref<6x8x128xf32, #tpu.memory_space<vmem>>, %arg3: memref<4x8x128xf32, #tpu.memory_space<vmem>>) attributes {dimension_semantics = [#tpu.dimension_semantics<parallel>], iteration_bounds = array<i64: 4>, scalar_prefetch = 0 : i64, scratch_operands = 0 : i64, tpu.core_type = #tpu.core_type<tc>, window_params = [{transform_indices = @transform_0, window_bounds = array<i64: 146>}, {transform_indices = @transform_1, window_bounds = array<i64: 6, 8, 128>}, {transform_indices = @transform_2, window_bounds = array<i64: 4, 8, 128>}]} {
    %c0_i32 = arith.constant 0 : i32
    %c1_i32 = arith.constant 1 : i32
    %0 = arith.muli %c0_i32, %c1_i32 : i32
    %c0_i32_0 = arith.constant 0 : i32
    %1 = arith.addi %c0_i32_0, %0 : i32
    %c8_i32 = arith.constant 8 : i32
    %2 = arith.muli %1, %c8_i32 : i32
    %3 = tpu.assume_multiple %2, 8 : i32
    %c0 = arith.constant 0 : index
    %4 = arith.index_cast %3 : i32 to index
    %c0_1 = arith.constant 0 : index
    %5 = vector.load %arg2[%c0, %4, %c0_1] : memref<6x8x128xf32, #tpu.memory_space<vmem>>, vector<1x8x128xf32>
    %6 = vector.shape_cast %5 : vector<1x8x128xf32> to vector<8x128xf32>
    %c1 = arith.constant 1 : index
    %7 = arith.index_cast %3 : i32 to index
    %c0_2 = arith.constant 0 : index
    %8 = vector.load %arg2[%c1, %7, %c0_2] : memref<6x8x128xf32, #tpu.memory_space<vmem>>, vector<1x8x128xf32>
    %9 = vector.shape_cast %8 : vector<1x8x128xf32> to vector<8x128xf32>
    %c2 = arith.constant 2 : index
    %10 = arith.index_cast %3 : i32 to index
    %c0_3 = arith.constant 0 : index
    %11 = vector.load %arg2[%c2, %10, %c0_3] : memref<6x8x128xf32, #tpu.memory_space<vmem>>, vector<1x8x128xf32>
    %12 = vector.shape_cast %11 : vector<1x8x128xf32> to vector<8x128xf32>
    %c3 = arith.constant 3 : index
    %13 = arith.index_cast %3 : i32 to index
    %c0_4 = arith.constant 0 : index
    %14 = vector.load %arg2[%c3, %13, %c0_4] : memref<6x8x128xf32, #tpu.memory_space<vmem>>, vector<1x8x128xf32>
    %15 = vector.shape_cast %14 : vector<1x8x128xf32> to vector<8x128xf32>
    %c4 = arith.constant 4 : index
    %16 = arith.index_cast %3 : i32 to index
    %c0_5 = arith.constant 0 : index
    %17 = vector.load %arg2[%c4, %16, %c0_5] : memref<6x8x128xf32, #tpu.memory_space<vmem>>, vector<1x8x128xf32>
    %18 = vector.shape_cast %17 : vector<1x8x128xf32> to vector<8x128xf32>
    %c5 = arith.constant 5 : index
    %19 = arith.index_cast %3 : i32 to index
    %c0_6 = arith.constant 0 : index
    %20 = vector.load %arg2[%c5, %19, %c0_6] : memref<6x8x128xf32, #tpu.memory_space<vmem>>, vector<1x8x128xf32>
    %21 = vector.shape_cast %20 : vector<1x8x128xf32> to vector<8x128xf32>
    %22 = math.cos %6 : vector<8x128xf32>
    %23 = math.sin %6 : vector<8x128xf32>
    %24 = math.cos %12 : vector<8x128xf32>
    %25 = math.sin %12 : vector<8x128xf32>
    %26 = arith.mulf %22, %24 : vector<8x128xf32>
    %27 = arith.mulf %23, %25 : vector<8x128xf32>
    %28 = arith.addf %26, %27 : vector<8x128xf32>
    %29 = arith.mulf %23, %24 : vector<8x128xf32>
    %30 = arith.mulf %25, %22 : vector<8x128xf32>
    %31 = arith.subf %29, %30 : vector<8x128xf32>
    %cst = arith.constant 5.000000e-01 : f32
    %32 = vector.broadcast %cst : f32 to vector<8x128xf32>
    %33 = arith.mulf %32, %18 : vector<8x128xf32>
    %cst_7 = arith.constant 2.500000e-01 : f32
    %34 = vector.broadcast %cst_7 : f32 to vector<8x128xf32>
    %35 = arith.mulf %34, %28 : vector<8x128xf32>
    %36 = arith.mulf %35, %21 : vector<8x128xf32>
    %37 = arith.addf %33, %36 : vector<8x128xf32>
    %cst_8 = arith.constant 5.000000e-01 : f32
    %38 = vector.broadcast %cst_8 : f32 to vector<8x128xf32>
    %39 = arith.mulf %38, %21 : vector<8x128xf32>
    %40 = arith.mulf %28, %18 : vector<8x128xf32>
    %41 = arith.mulf %31, %21 : vector<8x128xf32>
    %42 = arith.subf %40, %41 : vector<8x128xf32>
    %cst_9 = arith.constant 2.500000e-01 : f32
    %43 = vector.broadcast %cst_9 : f32 to vector<8x128xf32>
    %44 = arith.mulf %43, %42 : vector<8x128xf32>
    %45 = arith.addf %39, %44 : vector<8x128xf32>
    %c0_10 = arith.constant 0 : index
    %46 = memref.load %arg1[%c0_10] : memref<146xf32, #tpu.memory_space<smem>>
    %47 = vector.broadcast %46 : f32 to vector<8x128xf32>
    %48 = arith.mulf %22, %47 : vector<8x128xf32>
    %c1_11 = arith.constant 1 : index
    %49 = memref.load %arg1[%c1_11] : memref<146xf32, #tpu.memory_space<smem>>
    %50 = vector.broadcast %49 : f32 to vector<8x128xf32>
    %51 = arith.mulf %23, %50 : vector<8x128xf32>
    %52 = arith.addf %48, %51 : vector<8x128xf32>
    %c2_12 = arith.constant 2 : index
    %53 = memref.load %arg1[%c2_12] : memref<146xf32, #tpu.memory_space<smem>>
    %54 = vector.broadcast %53 : f32 to vector<8x128xf32>
    %55 = arith.mulf %24, %54 : vector<8x128xf32>
    %56 = arith.addf %52, %55 : vector<8x128xf32>
    %c3_13 = arith.constant 3 : index
    %57 = memref.load %arg1[%c3_13] : memref<146xf32, #tpu.memory_space<smem>>
    %58 = vector.broadcast %57 : f32 to vector<8x128xf32>
    %59 = arith.mulf %25, %58 : vector<8x128xf32>
    %60 = arith.addf %56, %59 : vector<8x128xf32>
    %c4_14 = arith.constant 4 : index
    %61 = memref.load %arg1[%c4_14] : memref<146xf32, #tpu.memory_space<smem>>
    %62 = vector.broadcast %61 : f32 to vector<8x128xf32>
    %63 = arith.mulf %9, %62 : vector<8x128xf32>
    %64 = arith.addf %60, %63 : vector<8x128xf32>
    %c5_15 = arith.constant 5 : index
    %65 = memref.load %arg1[%c5_15] : memref<146xf32, #tpu.memory_space<smem>>
    %66 = vector.broadcast %65 : f32 to vector<8x128xf32>
    %67 = arith.mulf %15, %66 : vector<8x128xf32>
    %68 = arith.addf %64, %67 : vector<8x128xf32>
    %c48 = arith.constant 48 : index
    %69 = memref.load %arg1[%c48] : memref<146xf32, #tpu.memory_space<smem>>
    %70 = vector.broadcast %69 : f32 to vector<8x128xf32>
    %71 = arith.addf %68, %70 : vector<8x128xf32>
    %72 = math.tanh %71 : vector<8x128xf32>
    %c6 = arith.constant 6 : index
    %73 = memref.load %arg1[%c6] : memref<146xf32, #tpu.memory_space<smem>>
    %74 = vector.broadcast %73 : f32 to vector<8x128xf32>
    %75 = arith.mulf %22, %74 : vector<8x128xf32>
    %c7 = arith.constant 7 : index
    %76 = memref.load %arg1[%c7] : memref<146xf32, #tpu.memory_space<smem>>
    %77 = vector.broadcast %76 : f32 to vector<8x128xf32>
    %78 = arith.mulf %23, %77 : vector<8x128xf32>
    %79 = arith.addf %75, %78 : vector<8x128xf32>
    %c8 = arith.constant 8 : index
    %80 = memref.load %arg1[%c8] : memref<146xf32, #tpu.memory_space<smem>>
    %81 = vector.broadcast %80 : f32 to vector<8x128xf32>
    %82 = arith.mulf %24, %81 : vector<8x128xf32>
    %83 = arith.addf %79, %82 : vector<8x128xf32>
    %c9 = arith.constant 9 : index
    %84 = memref.load %arg1[%c9] : memref<146xf32, #tpu.memory_space<smem>>
    %85 = vector.broadcast %84 : f32 to vector<8x128xf32>
    %86 = arith.mulf %25, %85 : vector<8x128xf32>
    %87 = arith.addf %83, %86 : vector<8x128xf32>
    %c10 = arith.constant 10 : index
    %88 = memref.load %arg1[%c10] : memref<146xf32, #tpu.memory_space<smem>>
    %89 = vector.broadcast %88 : f32 to vector<8x128xf32>
    %90 = arith.mulf %9, %89 : vector<8x128xf32>
    %91 = arith.addf %87, %90 : vector<8x128xf32>
    %c11 = arith.constant 11 : index
    %92 = memref.load %arg1[%c11] : memref<146xf32, #tpu.memory_space<smem>>
    %93 = vector.broadcast %92 : f32 to vector<8x128xf32>
    %94 = arith.mulf %15, %93 : vector<8x128xf32>
    %95 = arith.addf %91, %94 : vector<8x128xf32>
    %c49 = arith.constant 49 : index
    %96 = memref.load %arg1[%c49] : memref<146xf32, #tpu.memory_space<smem>>
    %97 = vector.broadcast %96 : f32 to vector<8x128xf32>
    %98 = arith.addf %95, %97 : vector<8x128xf32>
    %99 = math.tanh %98 : vector<8x128xf32>
    %c12 = arith.constant 12 : index
    %100 = memref.load %arg1[%c12] : memref<146xf32, #tpu.memory_space<smem>>
    %101 = vector.broadcast %100 : f32 to vector<8x128xf32>
    %102 = arith.mulf %22, %101 : vector<8x128xf32>
    %c13 = arith.constant 13 : index
    %103 = memref.load %arg1[%c13] : memref<146xf32, #tpu.memory_space<smem>>
    %104 = vector.broadcast %103 : f32 to vector<8x128xf32>
    %105 = arith.mulf %23, %104 : vector<8x128xf32>
    %106 = arith.addf %102, %105 : vector<8x128xf32>
    %c14 = arith.constant 14 : index
    %107 = memref.load %arg1[%c14] : memref<146xf32, #tpu.memory_space<smem>>
    %108 = vector.broadcast %107 : f32 to vector<8x128xf32>
    %109 = arith.mulf %24, %108 : vector<8x128xf32>
    %110 = arith.addf %106, %109 : vector<8x128xf32>
    %c15 = arith.constant 15 : index
    %111 = memref.load %arg1[%c15] : memref<146xf32, #tpu.memory_space<smem>>
    %112 = vector.broadcast %111 : f32 to vector<8x128xf32>
    %113 = arith.mulf %25, %112 : vector<8x128xf32>
    %114 = arith.addf %110, %113 : vector<8x128xf32>
    %c16 = arith.constant 16 : index
    %115 = memref.load %arg1[%c16] : memref<146xf32, #tpu.memory_space<smem>>
    %116 = vector.broadcast %115 : f32 to vector<8x128xf32>
    %117 = arith.mulf %9, %116 : vector<8x128xf32>
    %118 = arith.addf %114, %117 : vector<8x128xf32>
    %c17 = arith.constant 17 : index
    %119 = memref.load %arg1[%c17] : memref<146xf32, #tpu.memory_space<smem>>
    %120 = vector.broadcast %119 : f32 to vector<8x128xf32>
    %121 = arith.mulf %15, %120 : vector<8x128xf32>
    %122 = arith.addf %118, %121 : vector<8x128xf32>
    %c50 = arith.constant 50 : index
    %123 = memref.load %arg1[%c50] : memref<146xf32, #tpu.memory_space<smem>>
    %124 = vector.broadcast %123 : f32 to vector<8x128xf32>
    %125 = arith.addf %122, %124 : vector<8x128xf32>
    %126 = math.tanh %125 : vector<8x128xf32>
    %c18 = arith.constant 18 : index
    %127 = memref.load %arg1[%c18] : memref<146xf32, #tpu.memory_space<smem>>
    %128 = vector.broadcast %127 : f32 to vector<8x128xf32>
    %129 = arith.mulf %22, %128 : vector<8x128xf32>
    %c19 = arith.constant 19 : index
    %130 = memref.load %arg1[%c19] : memref<146xf32, #tpu.memory_space<smem>>
    %131 = vector.broadcast %130 : f32 to vector<8x128xf32>
    %132 = arith.mulf %23, %131 : vector<8x128xf32>
    %133 = arith.addf %129, %132 : vector<8x128xf32>
    %c20 = arith.constant 20 : index
    %134 = memref.load %arg1[%c20] : memref<146xf32, #tpu.memory_space<smem>>
    %135 = vector.broadcast %134 : f32 to vector<8x128xf32>
    %136 = arith.mulf %24, %135 : vector<8x128xf32>
    %137 = arith.addf %133, %136 : vector<8x128xf32>
    %c21 = arith.constant 21 : index
    %138 = memref.load %arg1[%c21] : memref<146xf32, #tpu.memory_space<smem>>
    %139 = vector.broadcast %138 : f32 to vector<8x128xf32>
    %140 = arith.mulf %25, %139 : vector<8x128xf32>
    %141 = arith.addf %137, %140 : vector<8x128xf32>
    %c22 = arith.constant 22 : index
    %142 = memref.load %arg1[%c22] : memref<146xf32, #tpu.memory_space<smem>>
    %143 = vector.broadcast %142 : f32 to vector<8x128xf32>
    %144 = arith.mulf %9, %143 : vector<8x128xf32>
    %145 = arith.addf %141, %144 : vector<8x128xf32>
    %c23 = arith.constant 23 : index
    %146 = memref.load %arg1[%c23] : memref<146xf32, #tpu.memory_space<smem>>
    %147 = vector.broadcast %146 : f32 to vector<8x128xf32>
    %148 = arith.mulf %15, %147 : vector<8x128xf32>
    %149 = arith.addf %145, %148 : vector<8x128xf32>
    %c51 = arith.constant 51 : index
    %150 = memref.load %arg1[%c51] : memref<146xf32, #tpu.memory_space<smem>>
    %151 = vector.broadcast %150 : f32 to vector<8x128xf32>
    %152 = arith.addf %149, %151 : vector<8x128xf32>
    %153 = math.tanh %152 : vector<8x128xf32>
    %c24 = arith.constant 24 : index
    %154 = memref.load %arg1[%c24] : memref<146xf32, #tpu.memory_space<smem>>
    %155 = vector.broadcast %154 : f32 to vector<8x128xf32>
    %156 = arith.mulf %22, %155 : vector<8x128xf32>
    %c25 = arith.constant 25 : index
    %157 = memref.load %arg1[%c25] : memref<146xf32, #tpu.memory_space<smem>>
    %158 = vector.broadcast %157 : f32 to vector<8x128xf32>
    %159 = arith.mulf %23, %158 : vector<8x128xf32>
    %160 = arith.addf %156, %159 : vector<8x128xf32>
    %c26 = arith.constant 26 : index
    %161 = memref.load %arg1[%c26] : memref<146xf32, #tpu.memory_space<smem>>
    %162 = vector.broadcast %161 : f32 to vector<8x128xf32>
    %163 = arith.mulf %24, %162 : vector<8x128xf32>
    %164 = arith.addf %160, %163 : vector<8x128xf32>
    %c27 = arith.constant 27 : index
    %165 = memref.load %arg1[%c27] : memref<146xf32, #tpu.memory_space<smem>>
    %166 = vector.broadcast %165 : f32 to vector<8x128xf32>
    %167 = arith.mulf %25, %166 : vector<8x128xf32>
    %168 = arith.addf %164, %167 : vector<8x128xf32>
    %c28 = arith.constant 28 : index
    %169 = memref.load %arg1[%c28] : memref<146xf32, #tpu.memory_space<smem>>
    %170 = vector.broadcast %169 : f32 to vector<8x128xf32>
    %171 = arith.mulf %9, %170 : vector<8x128xf32>
    %172 = arith.addf %168, %171 : vector<8x128xf32>
    %c29 = arith.constant 29 : index
    %173 = memref.load %arg1[%c29] : memref<146xf32, #tpu.memory_space<smem>>
    %174 = vector.broadcast %173 : f32 to vector<8x128xf32>
    %175 = arith.mulf %15, %174 : vector<8x128xf32>
    %176 = arith.addf %172, %175 : vector<8x128xf32>
    %c52 = arith.constant 52 : index
    %177 = memref.load %arg1[%c52] : memref<146xf32, #tpu.memory_space<smem>>
    %178 = vector.broadcast %177 : f32 to vector<8x128xf32>
    %179 = arith.addf %176, %178 : vector<8x128xf32>
    %180 = math.tanh %179 : vector<8x128xf32>
    %c30 = arith.constant 30 : index
    %181 = memref.load %arg1[%c30] : memref<146xf32, #tpu.memory_space<smem>>
    %182 = vector.broadcast %181 : f32 to vector<8x128xf32>
    %183 = arith.mulf %22, %182 : vector<8x128xf32>
    %c31 = arith.constant 31 : index
    %184 = memref.load %arg1[%c31] : memref<146xf32, #tpu.memory_space<smem>>
    %185 = vector.broadcast %184 : f32 to vector<8x128xf32>
    %186 = arith.mulf %23, %185 : vector<8x128xf32>
    %187 = arith.addf %183, %186 : vector<8x128xf32>
    %c32 = arith.constant 32 : index
    %188 = memref.load %arg1[%c32] : memref<146xf32, #tpu.memory_space<smem>>
    %189 = vector.broadcast %188 : f32 to vector<8x128xf32>
    %190 = arith.mulf %24, %189 : vector<8x128xf32>
    %191 = arith.addf %187, %190 : vector<8x128xf32>
    %c33 = arith.constant 33 : index
    %192 = memref.load %arg1[%c33] : memref<146xf32, #tpu.memory_space<smem>>
    %193 = vector.broadcast %192 : f32 to vector<8x128xf32>
    %194 = arith.mulf %25, %193 : vector<8x128xf32>
    %195 = arith.addf %191, %194 : vector<8x128xf32>
    %c34 = arith.constant 34 : index
    %196 = memref.load %arg1[%c34] : memref<146xf32, #tpu.memory_space<smem>>
    %197 = vector.broadcast %196 : f32 to vector<8x128xf32>
    %198 = arith.mulf %9, %197 : vector<8x128xf32>
    %199 = arith.addf %195, %198 : vector<8x128xf32>
    %c35 = arith.constant 35 : index
    %200 = memref.load %arg1[%c35] : memref<146xf32, #tpu.memory_space<smem>>
    %201 = vector.broadcast %200 : f32 to vector<8x128xf32>
    %202 = arith.mulf %15, %201 : vector<8x128xf32>
    %203 = arith.addf %199, %202 : vector<8x128xf32>
    %c53 = arith.constant 53 : index
    %204 = memref.load %arg1[%c53] : memref<146xf32, #tpu.memory_space<smem>>
    %205 = vector.broadcast %204 : f32 to vector<8x128xf32>
    %206 = arith.addf %203, %205 : vector<8x128xf32>
    %207 = math.tanh %206 : vector<8x128xf32>
    %c36 = arith.constant 36 : index
    %208 = memref.load %arg1[%c36] : memref<146xf32, #tpu.memory_space<smem>>
    %209 = vector.broadcast %208 : f32 to vector<8x128xf32>
    %210 = arith.mulf %22, %209 : vector<8x128xf32>
    %c37 = arith.constant 37 : index
    %211 = memref.load %arg1[%c37] : memref<146xf32, #tpu.memory_space<smem>>
    %212 = vector.broadcast %211 : f32 to vector<8x128xf32>
    %213 = arith.mulf %23, %212 : vector<8x128xf32>
    %214 = arith.addf %210, %213 : vector<8x128xf32>
    %c38 = arith.constant 38 : index
    %215 = memref.load %arg1[%c38] : memref<146xf32, #tpu.memory_space<smem>>
    %216 = vector.broadcast %215 : f32 to vector<8x128xf32>
    %217 = arith.mulf %24, %216 : vector<8x128xf32>
    %218 = arith.addf %214, %217 : vector<8x128xf32>
    %c39 = arith.constant 39 : index
    %219 = memref.load %arg1[%c39] : memref<146xf32, #tpu.memory_space<smem>>
    %220 = vector.broadcast %219 : f32 to vector<8x128xf32>
    %221 = arith.mulf %25, %220 : vector<8x128xf32>
    %222 = arith.addf %218, %221 : vector<8x128xf32>
    %c40 = arith.constant 40 : index
    %223 = memref.load %arg1[%c40] : memref<146xf32, #tpu.memory_space<smem>>
    %224 = vector.broadcast %223 : f32 to vector<8x128xf32>
    %225 = arith.mulf %9, %224 : vector<8x128xf32>
    %226 = arith.addf %222, %225 : vector<8x128xf32>
    %c41 = arith.constant 41 : index
    %227 = memref.load %arg1[%c41] : memref<146xf32, #tpu.memory_space<smem>>
    %228 = vector.broadcast %227 : f32 to vector<8x128xf32>
    %229 = arith.mulf %15, %228 : vector<8x128xf32>
    %230 = arith.addf %226, %229 : vector<8x128xf32>
    %c54 = arith.constant 54 : index
    %231 = memref.load %arg1[%c54] : memref<146xf32, #tpu.memory_space<smem>>
    %232 = vector.broadcast %231 : f32 to vector<8x128xf32>
    %233 = arith.addf %230, %232 : vector<8x128xf32>
    %234 = math.tanh %233 : vector<8x128xf32>
    %c42 = arith.constant 42 : index
    %235 = memref.load %arg1[%c42] : memref<146xf32, #tpu.memory_space<smem>>
    %236 = vector.broadcast %235 : f32 to vector<8x128xf32>
    %237 = arith.mulf %22, %236 : vector<8x128xf32>
    %c43 = arith.constant 43 : index
    %238 = memref.load %arg1[%c43] : memref<146xf32, #tpu.memory_space<smem>>
    %239 = vector.broadcast %238 : f32 to vector<8x128xf32>
    %240 = arith.mulf %23, %239 : vector<8x128xf32>
    %241 = arith.addf %237, %240 : vector<8x128xf32>
    %c44 = arith.constant 44 : index
    %242 = memref.load %arg1[%c44] : memref<146xf32, #tpu.memory_space<smem>>
    %243 = vector.broadcast %242 : f32 to vector<8x128xf32>
    %244 = arith.mulf %24, %243 : vector<8x128xf32>
    %245 = arith.addf %241, %244 : vector<8x128xf32>
    %c45 = arith.constant 45 : index
    %246 = memref.load %arg1[%c45] : memref<146xf32, #tpu.memory_space<smem>>
    %247 = vector.broadcast %246 : f32 to vector<8x128xf32>
    %248 = arith.mulf %25, %247 : vector<8x128xf32>
    %249 = arith.addf %245, %248 : vector<8x128xf32>
    %c46 = arith.constant 46 : index
    %250 = memref.load %arg1[%c46] : memref<146xf32, #tpu.memory_space<smem>>
    %251 = vector.broadcast %250 : f32 to vector<8x128xf32>
    %252 = arith.mulf %9, %251 : vector<8x128xf32>
    %253 = arith.addf %249, %252 : vector<8x128xf32>
    %c47 = arith.constant 47 : index
    %254 = memref.load %arg1[%c47] : memref<146xf32, #tpu.memory_space<smem>>
    %255 = vector.broadcast %254 : f32 to vector<8x128xf32>
    %256 = arith.mulf %15, %255 : vector<8x128xf32>
    %257 = arith.addf %253, %256 : vector<8x128xf32>
    %c55 = arith.constant 55 : index
    %258 = memref.load %arg1[%c55] : memref<146xf32, #tpu.memory_space<smem>>
    %259 = vector.broadcast %258 : f32 to vector<8x128xf32>
    %260 = arith.addf %257, %259 : vector<8x128xf32>
    %261 = math.tanh %260 : vector<8x128xf32>
    %c56 = arith.constant 56 : index
    %262 = memref.load %arg1[%c56] : memref<146xf32, #tpu.memory_space<smem>>
    %263 = vector.broadcast %262 : f32 to vector<8x128xf32>
    %264 = arith.mulf %72, %263 : vector<8x128xf32>
    %c57 = arith.constant 57 : index
    %265 = memref.load %arg1[%c57] : memref<146xf32, #tpu.memory_space<smem>>
    %266 = vector.broadcast %265 : f32 to vector<8x128xf32>
    %267 = arith.mulf %99, %266 : vector<8x128xf32>
    %268 = arith.addf %264, %267 : vector<8x128xf32>
    %c58 = arith.constant 58 : index
    %269 = memref.load %arg1[%c58] : memref<146xf32, #tpu.memory_space<smem>>
    %270 = vector.broadcast %269 : f32 to vector<8x128xf32>
    %271 = arith.mulf %126, %270 : vector<8x128xf32>
    %272 = arith.addf %268, %271 : vector<8x128xf32>
    %c59 = arith.constant 59 : index
    %273 = memref.load %arg1[%c59] : memref<146xf32, #tpu.memory_space<smem>>
    %274 = vector.broadcast %273 : f32 to vector<8x128xf32>
    %275 = arith.mulf %153, %274 : vector<8x128xf32>
    %276 = arith.addf %272, %275 : vector<8x128xf32>
    %c60 = arith.constant 60 : index
    %277 = memref.load %arg1[%c60] : memref<146xf32, #tpu.memory_space<smem>>
    %278 = vector.broadcast %277 : f32 to vector<8x128xf32>
    %279 = arith.mulf %180, %278 : vector<8x128xf32>
    %280 = arith.addf %276, %279 : vector<8x128xf32>
    %c61 = arith.constant 61 : index
    %281 = memref.load %arg1[%c61] : memref<146xf32, #tpu.memory_space<smem>>
    %282 = vector.broadcast %281 : f32 to vector<8x128xf32>
    %283 = arith.mulf %207, %282 : vector<8x128xf32>
    %284 = arith.addf %280, %283 : vector<8x128xf32>
    %c62 = arith.constant 62 : index
    %285 = memref.load %arg1[%c62] : memref<146xf32, #tpu.memory_space<smem>>
    %286 = vector.broadcast %285 : f32 to vector<8x128xf32>
    %287 = arith.mulf %234, %286 : vector<8x128xf32>
    %288 = arith.addf %284, %287 : vector<8x128xf32>
    %c63 = arith.constant 63 : index
    %289 = memref.load %arg1[%c63] : memref<146xf32, #tpu.memory_space<smem>>
    %290 = vector.broadcast %289 : f32 to vector<8x128xf32>
    %291 = arith.mulf %261, %290 : vector<8x128xf32>
    %292 = arith.addf %288, %291 : vector<8x128xf32>
    %c120 = arith.constant 120 : index
    %293 = memref.load %arg1[%c120] : memref<146xf32, #tpu.memory_space<smem>>
    %294 = vector.broadcast %293 : f32 to vector<8x128xf32>
    %295 = arith.addf %292, %294 : vector<8x128xf32>
    %296 = math.tanh %295 : vector<8x128xf32>
    %c64 = arith.constant 64 : index
    %297 = memref.load %arg1[%c64] : memref<146xf32, #tpu.memory_space<smem>>
    %298 = vector.broadcast %297 : f32 to vector<8x128xf32>
    %299 = arith.mulf %72, %298 : vector<8x128xf32>
    %c65 = arith.constant 65 : index
    %300 = memref.load %arg1[%c65] : memref<146xf32, #tpu.memory_space<smem>>
    %301 = vector.broadcast %300 : f32 to vector<8x128xf32>
    %302 = arith.mulf %99, %301 : vector<8x128xf32>
    %303 = arith.addf %299, %302 : vector<8x128xf32>
    %c66 = arith.constant 66 : index
    %304 = memref.load %arg1[%c66] : memref<146xf32, #tpu.memory_space<smem>>
    %305 = vector.broadcast %304 : f32 to vector<8x128xf32>
    %306 = arith.mulf %126, %305 : vector<8x128xf32>
    %307 = arith.addf %303, %306 : vector<8x128xf32>
    %c67 = arith.constant 67 : index
    %308 = memref.load %arg1[%c67] : memref<146xf32, #tpu.memory_space<smem>>
    %309 = vector.broadcast %308 : f32 to vector<8x128xf32>
    %310 = arith.mulf %153, %309 : vector<8x128xf32>
    %311 = arith.addf %307, %310 : vector<8x128xf32>
    %c68 = arith.constant 68 : index
    %312 = memref.load %arg1[%c68] : memref<146xf32, #tpu.memory_space<smem>>
    %313 = vector.broadcast %312 : f32 to vector<8x128xf32>
    %314 = arith.mulf %180, %313 : vector<8x128xf32>
    %315 = arith.addf %311, %314 : vector<8x128xf32>
    %c69 = arith.constant 69 : index
    %316 = memref.load %arg1[%c69] : memref<146xf32, #tpu.memory_space<smem>>
    %317 = vector.broadcast %316 : f32 to vector<8x128xf32>
    %318 = arith.mulf %207, %317 : vector<8x128xf32>
    %319 = arith.addf %315, %318 : vector<8x128xf32>
    %c70 = arith.constant 70 : index
    %320 = memref.load %arg1[%c70] : memref<146xf32, #tpu.memory_space<smem>>
    %321 = vector.broadcast %320 : f32 to vector<8x128xf32>
    %322 = arith.mulf %234, %321 : vector<8x128xf32>
    %323 = arith.addf %319, %322 : vector<8x128xf32>
    %c71 = arith.constant 71 : index
    %324 = memref.load %arg1[%c71] : memref<146xf32, #tpu.memory_space<smem>>
    %325 = vector.broadcast %324 : f32 to vector<8x128xf32>
    %326 = arith.mulf %261, %325 : vector<8x128xf32>
    %327 = arith.addf %323, %326 : vector<8x128xf32>
    %c121 = arith.constant 121 : index
    %328 = memref.load %arg1[%c121] : memref<146xf32, #tpu.memory_space<smem>>
    %329 = vector.broadcast %328 : f32 to vector<8x128xf32>
    %330 = arith.addf %327, %329 : vector<8x128xf32>
    %331 = math.tanh %330 : vector<8x128xf32>
    %c72 = arith.constant 72 : index
    %332 = memref.load %arg1[%c72] : memref<146xf32, #tpu.memory_space<smem>>
    %333 = vector.broadcast %332 : f32 to vector<8x128xf32>
    %334 = arith.mulf %72, %333 : vector<8x128xf32>
    %c73 = arith.constant 73 : index
    %335 = memref.load %arg1[%c73] : memref<146xf32, #tpu.memory_space<smem>>
    %336 = vector.broadcast %335 : f32 to vector<8x128xf32>
    %337 = arith.mulf %99, %336 : vector<8x128xf32>
    %338 = arith.addf %334, %337 : vector<8x128xf32>
    %c74 = arith.constant 74 : index
    %339 = memref.load %arg1[%c74] : memref<146xf32, #tpu.memory_space<smem>>
    %340 = vector.broadcast %339 : f32 to vector<8x128xf32>
    %341 = arith.mulf %126, %340 : vector<8x128xf32>
    %342 = arith.addf %338, %341 : vector<8x128xf32>
    %c75 = arith.constant 75 : index
    %343 = memref.load %arg1[%c75] : memref<146xf32, #tpu.memory_space<smem>>
    %344 = vector.broadcast %343 : f32 to vector<8x128xf32>
    %345 = arith.mulf %153, %344 : vector<8x128xf32>
    %346 = arith.addf %342, %345 : vector<8x128xf32>
    %c76 = arith.constant 76 : index
    %347 = memref.load %arg1[%c76] : memref<146xf32, #tpu.memory_space<smem>>
    %348 = vector.broadcast %347 : f32 to vector<8x128xf32>
    %349 = arith.mulf %180, %348 : vector<8x128xf32>
    %350 = arith.addf %346, %349 : vector<8x128xf32>
    %c77 = arith.constant 77 : index
    %351 = memref.load %arg1[%c77] : memref<146xf32, #tpu.memory_space<smem>>
    %352 = vector.broadcast %351 : f32 to vector<8x128xf32>
    %353 = arith.mulf %207, %352 : vector<8x128xf32>
    %354 = arith.addf %350, %353 : vector<8x128xf32>
    %c78 = arith.constant 78 : index
    %355 = memref.load %arg1[%c78] : memref<146xf32, #tpu.memory_space<smem>>
    %356 = vector.broadcast %355 : f32 to vector<8x128xf32>
    %357 = arith.mulf %234, %356 : vector<8x128xf32>
    %358 = arith.addf %354, %357 : vector<8x128xf32>
    %c79 = arith.constant 79 : index
    %359 = memref.load %arg1[%c79] : memref<146xf32, #tpu.memory_space<smem>>
    %360 = vector.broadcast %359 : f32 to vector<8x128xf32>
    %361 = arith.mulf %261, %360 : vector<8x128xf32>
    %362 = arith.addf %358, %361 : vector<8x128xf32>
    %c122 = arith.constant 122 : index
    %363 = memref.load %arg1[%c122] : memref<146xf32, #tpu.memory_space<smem>>
    %364 = vector.broadcast %363 : f32 to vector<8x128xf32>
    %365 = arith.addf %362, %364 : vector<8x128xf32>
    %366 = math.tanh %365 : vector<8x128xf32>
    %c80 = arith.constant 80 : index
    %367 = memref.load %arg1[%c80] : memref<146xf32, #tpu.memory_space<smem>>
    %368 = vector.broadcast %367 : f32 to vector<8x128xf32>
    %369 = arith.mulf %72, %368 : vector<8x128xf32>
    %c81 = arith.constant 81 : index
    %370 = memref.load %arg1[%c81] : memref<146xf32, #tpu.memory_space<smem>>
    %371 = vector.broadcast %370 : f32 to vector<8x128xf32>
    %372 = arith.mulf %99, %371 : vector<8x128xf32>
    %373 = arith.addf %369, %372 : vector<8x128xf32>
    %c82 = arith.constant 82 : index
    %374 = memref.load %arg1[%c82] : memref<146xf32, #tpu.memory_space<smem>>
    %375 = vector.broadcast %374 : f32 to vector<8x128xf32>
    %376 = arith.mulf %126, %375 : vector<8x128xf32>
    %377 = arith.addf %373, %376 : vector<8x128xf32>
    %c83 = arith.constant 83 : index
    %378 = memref.load %arg1[%c83] : memref<146xf32, #tpu.memory_space<smem>>
    %379 = vector.broadcast %378 : f32 to vector<8x128xf32>
    %380 = arith.mulf %153, %379 : vector<8x128xf32>
    %381 = arith.addf %377, %380 : vector<8x128xf32>
    %c84 = arith.constant 84 : index
    %382 = memref.load %arg1[%c84] : memref<146xf32, #tpu.memory_space<smem>>
    %383 = vector.broadcast %382 : f32 to vector<8x128xf32>
    %384 = arith.mulf %180, %383 : vector<8x128xf32>
    %385 = arith.addf %381, %384 : vector<8x128xf32>
    %c85 = arith.constant 85 : index
    %386 = memref.load %arg1[%c85] : memref<146xf32, #tpu.memory_space<smem>>
    %387 = vector.broadcast %386 : f32 to vector<8x128xf32>
    %388 = arith.mulf %207, %387 : vector<8x128xf32>
    %389 = arith.addf %385, %388 : vector<8x128xf32>
    %c86 = arith.constant 86 : index
    %390 = memref.load %arg1[%c86] : memref<146xf32, #tpu.memory_space<smem>>
    %391 = vector.broadcast %390 : f32 to vector<8x128xf32>
    %392 = arith.mulf %234, %391 : vector<8x128xf32>
    %393 = arith.addf %389, %392 : vector<8x128xf32>
    %c87 = arith.constant 87 : index
    %394 = memref.load %arg1[%c87] : memref<146xf32, #tpu.memory_space<smem>>
    %395 = vector.broadcast %394 : f32 to vector<8x128xf32>
    %396 = arith.mulf %261, %395 : vector<8x128xf32>
    %397 = arith.addf %393, %396 : vector<8x128xf32>
    %c123 = arith.constant 123 : index
    %398 = memref.load %arg1[%c123] : memref<146xf32, #tpu.memory_space<smem>>
    %399 = vector.broadcast %398 : f32 to vector<8x128xf32>
    %400 = arith.addf %397, %399 : vector<8x128xf32>
    %401 = math.tanh %400 : vector<8x128xf32>
    %c88 = arith.constant 88 : index
    %402 = memref.load %arg1[%c88] : memref<146xf32, #tpu.memory_space<smem>>
    %403 = vector.broadcast %402 : f32 to vector<8x128xf32>
    %404 = arith.mulf %72, %403 : vector<8x128xf32>
    %c89 = arith.constant 89 : index
    %405 = memref.load %arg1[%c89] : memref<146xf32, #tpu.memory_space<smem>>
    %406 = vector.broadcast %405 : f32 to vector<8x128xf32>
    %407 = arith.mulf %99, %406 : vector<8x128xf32>
    %408 = arith.addf %404, %407 : vector<8x128xf32>
    %c90 = arith.constant 90 : index
    %409 = memref.load %arg1[%c90] : memref<146xf32, #tpu.memory_space<smem>>
    %410 = vector.broadcast %409 : f32 to vector<8x128xf32>
    %411 = arith.mulf %126, %410 : vector<8x128xf32>
    %412 = arith.addf %408, %411 : vector<8x128xf32>
    %c91 = arith.constant 91 : index
    %413 = memref.load %arg1[%c91] : memref<146xf32, #tpu.memory_space<smem>>
    %414 = vector.broadcast %413 : f32 to vector<8x128xf32>
    %415 = arith.mulf %153, %414 : vector<8x128xf32>
    %416 = arith.addf %412, %415 : vector<8x128xf32>
    %c92 = arith.constant 92 : index
    %417 = memref.load %arg1[%c92] : memref<146xf32, #tpu.memory_space<smem>>
    %418 = vector.broadcast %417 : f32 to vector<8x128xf32>
    %419 = arith.mulf %180, %418 : vector<8x128xf32>
    %420 = arith.addf %416, %419 : vector<8x128xf32>
    %c93 = arith.constant 93 : index
    %421 = memref.load %arg1[%c93] : memref<146xf32, #tpu.memory_space<smem>>
    %422 = vector.broadcast %421 : f32 to vector<8x128xf32>
    %423 = arith.mulf %207, %422 : vector<8x128xf32>
    %424 = arith.addf %420, %423 : vector<8x128xf32>
    %c94 = arith.constant 94 : index
    %425 = memref.load %arg1[%c94] : memref<146xf32, #tpu.memory_space<smem>>
    %426 = vector.broadcast %425 : f32 to vector<8x128xf32>
    %427 = arith.mulf %234, %426 : vector<8x128xf32>
    %428 = arith.addf %424, %427 : vector<8x128xf32>
    %c95 = arith.constant 95 : index
    %429 = memref.load %arg1[%c95] : memref<146xf32, #tpu.memory_space<smem>>
    %430 = vector.broadcast %429 : f32 to vector<8x128xf32>
    %431 = arith.mulf %261, %430 : vector<8x128xf32>
    %432 = arith.addf %428, %431 : vector<8x128xf32>
    %c124 = arith.constant 124 : index
    %433 = memref.load %arg1[%c124] : memref<146xf32, #tpu.memory_space<smem>>
    %434 = vector.broadcast %433 : f32 to vector<8x128xf32>
    %435 = arith.addf %432, %434 : vector<8x128xf32>
    %436 = math.tanh %435 : vector<8x128xf32>
    %c96 = arith.constant 96 : index
    %437 = memref.load %arg1[%c96] : memref<146xf32, #tpu.memory_space<smem>>
    %438 = vector.broadcast %437 : f32 to vector<8x128xf32>
    %439 = arith.mulf %72, %438 : vector<8x128xf32>
    %c97 = arith.constant 97 : index
    %440 = memref.load %arg1[%c97] : memref<146xf32, #tpu.memory_space<smem>>
    %441 = vector.broadcast %440 : f32 to vector<8x128xf32>
    %442 = arith.mulf %99, %441 : vector<8x128xf32>
    %443 = arith.addf %439, %442 : vector<8x128xf32>
    %c98 = arith.constant 98 : index
    %444 = memref.load %arg1[%c98] : memref<146xf32, #tpu.memory_space<smem>>
    %445 = vector.broadcast %444 : f32 to vector<8x128xf32>
    %446 = arith.mulf %126, %445 : vector<8x128xf32>
    %447 = arith.addf %443, %446 : vector<8x128xf32>
    %c99 = arith.constant 99 : index
    %448 = memref.load %arg1[%c99] : memref<146xf32, #tpu.memory_space<smem>>
    %449 = vector.broadcast %448 : f32 to vector<8x128xf32>
    %450 = arith.mulf %153, %449 : vector<8x128xf32>
    %451 = arith.addf %447, %450 : vector<8x128xf32>
    %c100 = arith.constant 100 : index
    %452 = memref.load %arg1[%c100] : memref<146xf32, #tpu.memory_space<smem>>
    %453 = vector.broadcast %452 : f32 to vector<8x128xf32>
    %454 = arith.mulf %180, %453 : vector<8x128xf32>
    %455 = arith.addf %451, %454 : vector<8x128xf32>
    %c101 = arith.constant 101 : index
    %456 = memref.load %arg1[%c101] : memref<146xf32, #tpu.memory_space<smem>>
    %457 = vector.broadcast %456 : f32 to vector<8x128xf32>
    %458 = arith.mulf %207, %457 : vector<8x128xf32>
    %459 = arith.addf %455, %458 : vector<8x128xf32>
    %c102 = arith.constant 102 : index
    %460 = memref.load %arg1[%c102] : memref<146xf32, #tpu.memory_space<smem>>
    %461 = vector.broadcast %460 : f32 to vector<8x128xf32>
    %462 = arith.mulf %234, %461 : vector<8x128xf32>
    %463 = arith.addf %459, %462 : vector<8x128xf32>
    %c103 = arith.constant 103 : index
    %464 = memref.load %arg1[%c103] : memref<146xf32, #tpu.memory_space<smem>>
    %465 = vector.broadcast %464 : f32 to vector<8x128xf32>
    %466 = arith.mulf %261, %465 : vector<8x128xf32>
    %467 = arith.addf %463, %466 : vector<8x128xf32>
    %c125 = arith.constant 125 : index
    %468 = memref.load %arg1[%c125] : memref<146xf32, #tpu.memory_space<smem>>
    %469 = vector.broadcast %468 : f32 to vector<8x128xf32>
    %470 = arith.addf %467, %469 : vector<8x128xf32>
    %471 = math.tanh %470 : vector<8x128xf32>
    %c104 = arith.constant 104 : index
    %472 = memref.load %arg1[%c104] : memref<146xf32, #tpu.memory_space<smem>>
    %473 = vector.broadcast %472 : f32 to vector<8x128xf32>
    %474 = arith.mulf %72, %473 : vector<8x128xf32>
    %c105 = arith.constant 105 : index
    %475 = memref.load %arg1[%c105] : memref<146xf32, #tpu.memory_space<smem>>
    %476 = vector.broadcast %475 : f32 to vector<8x128xf32>
    %477 = arith.mulf %99, %476 : vector<8x128xf32>
    %478 = arith.addf %474, %477 : vector<8x128xf32>
    %c106 = arith.constant 106 : index
    %479 = memref.load %arg1[%c106] : memref<146xf32, #tpu.memory_space<smem>>
    %480 = vector.broadcast %479 : f32 to vector<8x128xf32>
    %481 = arith.mulf %126, %480 : vector<8x128xf32>
    %482 = arith.addf %478, %481 : vector<8x128xf32>
    %c107 = arith.constant 107 : index
    %483 = memref.load %arg1[%c107] : memref<146xf32, #tpu.memory_space<smem>>
    %484 = vector.broadcast %483 : f32 to vector<8x128xf32>
    %485 = arith.mulf %153, %484 : vector<8x128xf32>
    %486 = arith.addf %482, %485 : vector<8x128xf32>
    %c108 = arith.constant 108 : index
    %487 = memref.load %arg1[%c108] : memref<146xf32, #tpu.memory_space<smem>>
    %488 = vector.broadcast %487 : f32 to vector<8x128xf32>
    %489 = arith.mulf %180, %488 : vector<8x128xf32>
    %490 = arith.addf %486, %489 : vector<8x128xf32>
    %c109 = arith.constant 109 : index
    %491 = memref.load %arg1[%c109] : memref<146xf32, #tpu.memory_space<smem>>
    %492 = vector.broadcast %491 : f32 to vector<8x128xf32>
    %493 = arith.mulf %207, %492 : vector<8x128xf32>
    %494 = arith.addf %490, %493 : vector<8x128xf32>
    %c110 = arith.constant 110 : index
    %495 = memref.load %arg1[%c110] : memref<146xf32, #tpu.memory_space<smem>>
    %496 = vector.broadcast %495 : f32 to vector<8x128xf32>
    %497 = arith.mulf %234, %496 : vector<8x128xf32>
    %498 = arith.addf %494, %497 : vector<8x128xf32>
    %c111 = arith.constant 111 : index
    %499 = memref.load %arg1[%c111] : memref<146xf32, #tpu.memory_space<smem>>
    %500 = vector.broadcast %499 : f32 to vector<8x128xf32>
    %501 = arith.mulf %261, %500 : vector<8x128xf32>
    %502 = arith.addf %498, %501 : vector<8x128xf32>
    %c126 = arith.constant 126 : index
    %503 = memref.load %arg1[%c126] : memref<146xf32, #tpu.memory_space<smem>>
    %504 = vector.broadcast %503 : f32 to vector<8x128xf32>
    %505 = arith.addf %502, %504 : vector<8x128xf32>
    %506 = math.tanh %505 : vector<8x128xf32>
    %c112 = arith.constant 112 : index
    %507 = memref.load %arg1[%c112] : memref<146xf32, #tpu.memory_space<smem>>
    %508 = vector.broadcast %507 : f32 to vector<8x128xf32>
    %509 = arith.mulf %72, %508 : vector<8x128xf32>
    %c113 = arith.constant 113 : index
    %510 = memref.load %arg1[%c113] : memref<146xf32, #tpu.memory_space<smem>>
    %511 = vector.broadcast %510 : f32 to vector<8x128xf32>
    %512 = arith.mulf %99, %511 : vector<8x128xf32>
    %513 = arith.addf %509, %512 : vector<8x128xf32>
    %c114 = arith.constant 114 : index
    %514 = memref.load %arg1[%c114] : memref<146xf32, #tpu.memory_space<smem>>
    %515 = vector.broadcast %514 : f32 to vector<8x128xf32>
    %516 = arith.mulf %126, %515 : vector<8x128xf32>
    %517 = arith.addf %513, %516 : vector<8x128xf32>
    %c115 = arith.constant 115 : index
    %518 = memref.load %arg1[%c115] : memref<146xf32, #tpu.memory_space<smem>>
    %519 = vector.broadcast %518 : f32 to vector<8x128xf32>
    %520 = arith.mulf %153, %519 : vector<8x128xf32>
    %521 = arith.addf %517, %520 : vector<8x128xf32>
    %c116 = arith.constant 116 : index
    %522 = memref.load %arg1[%c116] : memref<146xf32, #tpu.memory_space<smem>>
    %523 = vector.broadcast %522 : f32 to vector<8x128xf32>
    %524 = arith.mulf %180, %523 : vector<8x128xf32>
    %525 = arith.addf %521, %524 : vector<8x128xf32>
    %c117 = arith.constant 117 : index
    %526 = memref.load %arg1[%c117] : memref<146xf32, #tpu.memory_space<smem>>
    %527 = vector.broadcast %526 : f32 to vector<8x128xf32>
    %528 = arith.mulf %207, %527 : vector<8x128xf32>
    %529 = arith.addf %525, %528 : vector<8x128xf32>
    %c118 = arith.constant 118 : index
    %530 = memref.load %arg1[%c118] : memref<146xf32, #tpu.memory_space<smem>>
    %531 = vector.broadcast %530 : f32 to vector<8x128xf32>
    %532 = arith.mulf %234, %531 : vector<8x128xf32>
    %533 = arith.addf %529, %532 : vector<8x128xf32>
    %c119 = arith.constant 119 : index
    %534 = memref.load %arg1[%c119] : memref<146xf32, #tpu.memory_space<smem>>
    %535 = vector.broadcast %534 : f32 to vector<8x128xf32>
    %536 = arith.mulf %261, %535 : vector<8x128xf32>
    %537 = arith.addf %533, %536 : vector<8x128xf32>
    %c127 = arith.constant 127 : index
    %538 = memref.load %arg1[%c127] : memref<146xf32, #tpu.memory_space<smem>>
    %539 = vector.broadcast %538 : f32 to vector<8x128xf32>
    %540 = arith.addf %537, %539 : vector<8x128xf32>
    %541 = math.tanh %540 : vector<8x128xf32>
    %c128 = arith.constant 128 : index
    %542 = memref.load %arg1[%c128] : memref<146xf32, #tpu.memory_space<smem>>
    %543 = vector.broadcast %542 : f32 to vector<8x128xf32>
    %544 = arith.mulf %296, %543 : vector<8x128xf32>
    %c129 = arith.constant 129 : index
    %545 = memref.load %arg1[%c129] : memref<146xf32, #tpu.memory_space<smem>>
    %546 = vector.broadcast %545 : f32 to vector<8x128xf32>
    %547 = arith.mulf %331, %546 : vector<8x128xf32>
    %548 = arith.addf %544, %547 : vector<8x128xf32>
    %c130 = arith.constant 130 : index
    %549 = memref.load %arg1[%c130] : memref<146xf32, #tpu.memory_space<smem>>
    %550 = vector.broadcast %549 : f32 to vector<8x128xf32>
    %551 = arith.mulf %366, %550 : vector<8x128xf32>
    %552 = arith.addf %548, %551 : vector<8x128xf32>
    %c131 = arith.constant 131 : index
    %553 = memref.load %arg1[%c131] : memref<146xf32, #tpu.memory_space<smem>>
    %554 = vector.broadcast %553 : f32 to vector<8x128xf32>
    %555 = arith.mulf %401, %554 : vector<8x128xf32>
    %556 = arith.addf %552, %555 : vector<8x128xf32>
    %c132 = arith.constant 132 : index
    %557 = memref.load %arg1[%c132] : memref<146xf32, #tpu.memory_space<smem>>
    %558 = vector.broadcast %557 : f32 to vector<8x128xf32>
    %559 = arith.mulf %436, %558 : vector<8x128xf32>
    %560 = arith.addf %556, %559 : vector<8x128xf32>
    %c133 = arith.constant 133 : index
    %561 = memref.load %arg1[%c133] : memref<146xf32, #tpu.memory_space<smem>>
    %562 = vector.broadcast %561 : f32 to vector<8x128xf32>
    %563 = arith.mulf %471, %562 : vector<8x128xf32>
    %564 = arith.addf %560, %563 : vector<8x128xf32>
    %c134 = arith.constant 134 : index
    %565 = memref.load %arg1[%c134] : memref<146xf32, #tpu.memory_space<smem>>
    %566 = vector.broadcast %565 : f32 to vector<8x128xf32>
    %567 = arith.mulf %506, %566 : vector<8x128xf32>
    %568 = arith.addf %564, %567 : vector<8x128xf32>
    %c135 = arith.constant 135 : index
    %569 = memref.load %arg1[%c135] : memref<146xf32, #tpu.memory_space<smem>>
    %570 = vector.broadcast %569 : f32 to vector<8x128xf32>
    %571 = arith.mulf %541, %570 : vector<8x128xf32>
    %572 = arith.addf %568, %571 : vector<8x128xf32>
    %c144 = arith.constant 144 : index
    %573 = memref.load %arg1[%c144] : memref<146xf32, #tpu.memory_space<smem>>
    %574 = vector.broadcast %573 : f32 to vector<8x128xf32>
    %575 = arith.addf %572, %574 : vector<8x128xf32>
    %c136 = arith.constant 136 : index
    %576 = memref.load %arg1[%c136] : memref<146xf32, #tpu.memory_space<smem>>
    %577 = vector.broadcast %576 : f32 to vector<8x128xf32>
    %578 = arith.mulf %296, %577 : vector<8x128xf32>
    %c137 = arith.constant 137 : index
    %579 = memref.load %arg1[%c137] : memref<146xf32, #tpu.memory_space<smem>>
    %580 = vector.broadcast %579 : f32 to vector<8x128xf32>
    %581 = arith.mulf %331, %580 : vector<8x128xf32>
    %582 = arith.addf %578, %581 : vector<8x128xf32>
    %c138 = arith.constant 138 : index
    %583 = memref.load %arg1[%c138] : memref<146xf32, #tpu.memory_space<smem>>
    %584 = vector.broadcast %583 : f32 to vector<8x128xf32>
    %585 = arith.mulf %366, %584 : vector<8x128xf32>
    %586 = arith.addf %582, %585 : vector<8x128xf32>
    %c139 = arith.constant 139 : index
    %587 = memref.load %arg1[%c139] : memref<146xf32, #tpu.memory_space<smem>>
    %588 = vector.broadcast %587 : f32 to vector<8x128xf32>
    %589 = arith.mulf %401, %588 : vector<8x128xf32>
    %590 = arith.addf %586, %589 : vector<8x128xf32>
    %c140 = arith.constant 140 : index
    %591 = memref.load %arg1[%c140] : memref<146xf32, #tpu.memory_space<smem>>
    %592 = vector.broadcast %591 : f32 to vector<8x128xf32>
    %593 = arith.mulf %436, %592 : vector<8x128xf32>
    %594 = arith.addf %590, %593 : vector<8x128xf32>
    %c141 = arith.constant 141 : index
    %595 = memref.load %arg1[%c141] : memref<146xf32, #tpu.memory_space<smem>>
    %596 = vector.broadcast %595 : f32 to vector<8x128xf32>
    %597 = arith.mulf %471, %596 : vector<8x128xf32>
    %598 = arith.addf %594, %597 : vector<8x128xf32>
    %c142 = arith.constant 142 : index
    %599 = memref.load %arg1[%c142] : memref<146xf32, #tpu.memory_space<smem>>
    %600 = vector.broadcast %599 : f32 to vector<8x128xf32>
    %601 = arith.mulf %506, %600 : vector<8x128xf32>
    %602 = arith.addf %598, %601 : vector<8x128xf32>
    %c143 = arith.constant 143 : index
    %603 = memref.load %arg1[%c143] : memref<146xf32, #tpu.memory_space<smem>>
    %604 = vector.broadcast %603 : f32 to vector<8x128xf32>
    %605 = arith.mulf %541, %604 : vector<8x128xf32>
    %606 = arith.addf %602, %605 : vector<8x128xf32>
    %c145 = arith.constant 145 : index
    %607 = memref.load %arg1[%c145] : memref<146xf32, #tpu.memory_space<smem>>
    %608 = vector.broadcast %607 : f32 to vector<8x128xf32>
    %609 = arith.addf %606, %608 : vector<8x128xf32>
    %c0_16 = arith.constant 0 : index
    %610 = arith.index_cast %3 : i32 to index
    %c0_17 = arith.constant 0 : index
    %611 = vector.load %arg3[%c0_16, %610, %c0_17] : memref<4x8x128xf32, #tpu.memory_space<vmem>>, vector<1x8x128xf32>
    %612 = vector.shape_cast %611 : vector<1x8x128xf32> to vector<8x128xf32>
    %613 = vector.shape_cast %9 : vector<8x128xf32> to vector<1x8x128xf32>
    tpu.vector_store %arg3[%c0_16, %610, %c0_17], %613 {strides = array<i32>} : memref<4x8x128xf32, #tpu.memory_space<vmem>>, vector<1x8x128xf32>,
    %614 = arith.addf %37, %575 : vector<8x128xf32>
    %c1_18 = arith.constant 1 : index
    %615 = arith.index_cast %3 : i32 to index
    %c0_19 = arith.constant 0 : index
    %616 = vector.load %arg3[%c1_18, %615, %c0_19] : memref<4x8x128xf32, #tpu.memory_space<vmem>>, vector<1x8x128xf32>
    %617 = vector.shape_cast %616 : vector<1x8x128xf32> to vector<8x128xf32>
    %618 = vector.shape_cast %614 : vector<8x128xf32> to vector<1x8x128xf32>
    tpu.vector_store %arg3[%c1_18, %615, %c0_19], %618 {strides = array<i32>} : memref<4x8x128xf32, #tpu.memory_space<vmem>>, vector<1x8x128xf32>,
    %c2_20 = arith.constant 2 : index
    %619 = arith.index_cast %3 : i32 to index
    %c0_21 = arith.constant 0 : index
    %620 = vector.load %arg3[%c2_20, %619, %c0_21] : memref<4x8x128xf32, #tpu.memory_space<vmem>>, vector<1x8x128xf32>
    %621 = vector.shape_cast %620 : vector<1x8x128xf32> to vector<8x128xf32>
    %622 = vector.shape_cast %15 : vector<8x128xf32> to vector<1x8x128xf32>
    tpu.vector_store %arg3[%c2_20, %619, %c0_21], %622 {strides = array<i32>} : memref<4x8x128xf32, #tpu.memory_space<vmem>>, vector<1x8x128xf32>,
    %623 = arith.addf %45, %609 : vector<8x128xf32>
    %c3_22 = arith.constant 3 : index
    %624 = arith.index_cast %3 : i32 to index
    %c0_23 = arith.constant 0 : index
    %625 = vector.load %arg3[%c3_22, %624, %c0_23] : memref<4x8x128xf32, #tpu.memory_space<vmem>>, vector<1x8x128xf32>
    %626 = vector.shape_cast %625 : vector<1x8x128xf32> to vector<8x128xf32>
    %627 = vector.shape_cast %623 : vector<8x128xf32> to vector<1x8x128xf32>
    tpu.vector_store %arg3[%c3_22, %624, %c0_23], %627 {strides = array<i32>} : memref<4x8x128xf32, #tpu.memory_space<vmem>>, vector<1x8x128xf32>,
    %c1_i32_24 = arith.constant 1 : i32
    return
  }
  func.func @transform_0(%arg0: i32) -> i32 {
    %c0_i32 = arith.constant 0 : i32
    %c0_i32_0 = arith.constant 0 : i32
    return %c0_i32 : i32
  }
  func.func @transform_1(%arg0: i32) -> (i32, i32, i32) {
    %c0_i32 = arith.constant 0 : i32
    %c0_i32_0 = arith.constant 0 : i32
    %c0_i32_1 = arith.constant 0 : i32
    return %c0_i32, %arg0, %c0_i32_0 : i32, i32, i32
  }
  func.func @transform_2(%arg0: i32) -> (i32, i32, i32) {
    %c0_i32 = arith.constant 0 : i32
    %c0_i32_0 = arith.constant 0 : i32
    %c0_i32_1 = arith.constant 0 : i32
    return %c0_i32, %arg0, %c0_i32_0 : i32, i32, i32
  }
}

</mosaic_0001>

<bundles_post_ra>
// kernel: tpu_custom_call.1
= control target key start
LH: loop header
LB: loop body
LE: loop exit
PB: predicated region body
PF: predicated region fallthrough
CT: control target
= control target key end

     0   :  { %s2964_s0 = inlined_call_operand.hbm [shape: f32[146], index: 0, kind: input, shape index: {}]   ;;  %s2965_s1 = inlined_call_operand.hbm [shape: f32[6,32,128], index: 1, kind: input, shape index: {}]   ;;  %s2966_s2 = inlined_call_operand.hbm [shape: f32[4,32,128], index: 2, kind: output, shape index: {}]  }
   0x1   :  { %3062 = sst [smem:[#allocation86_spill]] %s2964_s0 }
   0x2   :  { %3063 = sst [smem:[#allocation87_spill]] %s2965_s1 }
   0x3   :  { %3064 = sst [smem:[#allocation88_spill]] %s2966_s2 }
   0x4   :  { %7 = vsyncpa [#allocation5], 0 }
   0x5   :  { %8 = vsyncpa [#allocation3], 0 }
   0x6   :  { %10 = vsyncpa [#allocation3 + $0x1], 0 }
   0x7   :  { %11 = vsyncpa [#allocation4], 0 }
   0x8   :  { %13 = vsyncpa [#allocation4 + $0x1], 0  ;;  %s1743_s9 = smov 0   ;;  %s1745_s10 = smov 0  }
   0x9   :  { %s1747_s11 = smov 0   ;;  %s1749_s12 = smov 0  }
   0xa LB: > { %3065 = sst [smem:[#allocation11_spill]] %s1699_s9  ;;  %s1764_s13 = sadd.s32 4294967295, %s1711_s12   ;;  %s1711_s12 = sphi %s1749_s12, %s3297_s12   ;;  %s1707_s11 = sphi %s1747_s11, %s3300_s11   ;;  %s1703_s10 = sphi %s1745_s10, %s3299_s10   ;;  %s1699_s9 = sphi %s1743_s9, %s3298_s9  }
   0xb   : > { %3066 = sst [smem:[#allocation12_spill]] %s1703_s10  ;;  %s1298_s14 = sadd.s32 4294967294, %s1711_s12  }
   0xc   : > { %3067 = sst [smem:[#allocation13_spill]] %s1707_s11  ;;  %s1768_s15 = sadd.s32 1, %s1711_s12  }
   0xd   : > { %3068 = sst [smem:[#allocation14_spill]] %s1711_s12  ;;  %s47_s16 = sadd.s32 1, %s1707_s11 }
   0xe   : > { %3069 = sst [smem:[#allocation15_spill]] %s1764_s13  ;;  %s44_s17 = ssub.s32 %s1711_s12, %s1768_s15 }
   0xf   : > { %3070 = sst [smem:[#allocation16_spill]] %s1768_s15  ;;  %p54_p0 = scmp.ne.s32.totalorder %s1707_s11, %s1703_s10 }
  0x10   : > { %p45_p1 = scmp.eq.s32.totalorder %s44_s17, 0  ;;  %p55_p2 = scmp.eq.s32.totalorder %s1711_s12, 0 }
  0x11   : > { %p60_p3 = scmp.ne.s32.totalorder %s1703_s10, %s1699_s9  ;;  %p2968_p4 = scmp.eq.s32.totalorder %s1764_s13, 0 }
  0x12   : > { %s1780_s18 = scalar_select %p45_p1, %s1707_s11, %s47_s16  }
  0x13   : > { %p1782_p5 = por %p55_p2, %p54_p0  ;;  %p1788_p6 = por %p2968_p4, %p60_p3 }
  0x14   : > { %3071 = sst [smem:[#allocation17_spill]] %s1780_s18  ;;  %p84_p7 = scmp.eq.s32.totalorder %s1764_s13, 3 }
  0x15   : > { %s3073_s20 = scalar_select %p1788_p6, 1, 0 }
  0x16   : > { %p90_p8 = scmp.eq.s32.totalorder %s1298_s14, 3  ;;  %p1299_p9 = scmp.ge.s32.totalorder %s1711_s12, 1 }
  0x17   : > { %p97_p10 = scmp.lt.s32.totalorder %s1711_s12, 5  ;;  %p1795_p11 = por %p84_p7, %p54_p0 }
  0x18   : > { %p1799_p12 = por %p90_p8, %p60_p3  ;;  %p1510_p2 = scmp.lt.s32.totalorder %s1711_s12, 4 }
  0x19   : > { %s3074_s21 = scalar_select %p1795_p11, 1, 0 }
  0x1a   : > { %s3076_s22 = scalar_select %p1799_p12, 1, 0 }
  0x1b   : > { %3075 = sst [smem:[#allocation18_spill]] %s3074_s21  ;;  %p1803_p13 = pnand %p1299_p9, %p97_p10 }
  0x1c   : > { %3077 = sst [smem:[#allocation19_spill]] %s3076_s22  ;;  %s119_s24 = sand.u32 1, %s1707_s11  }
  0x1d   : > { %p1497_p1 = pneg %p1803_p13  ;;  %s1302_s25 = sshll.u32 %s1711_s12, 7 }
  0x1e   : > { %p1816_p0 = pnand %p1510_p2, %p1782_p5  ;;  %s1479_s27 = smul.u32 48, %s119_s24 }
  0x1f   : > { %p1498_p6 = pnand %p1497_p1, %p2968_p4  ;;  %s3080_s0 = sld [smem:[#allocation86_spill]] }
  0x21   : > { %p1600_p7 = pneg %p1498_p6 }
  0x25   : > { %s1598_s30 = scalar_lea.hbm %s3080_s0, 32 }
  0x26   : > { %p1599_p3 = scmp.ne.s32.totalorder %s3080_s0, %s1598_s30  ;;  %p1605_p10 = scmp.lt.u32.totalorder %s1598_s30, %s3080_s0 }
  0x28   : > { %p1601_p8 = pnand %p1600_p7, %p1599_p3 }
  0x2a   : > { %p1602_p9 = pneg %p1601_p8 }
  0x2c   : > { %p1607_p5 = pnand %p1605_p10, %p1602_p9 }
  0x2e   : > { %1610 = shalt.err (!%p1607_p5)
}
  0x2f   : > { %s1713_s7 = smov [#allocation2]   ;;  %s3081_s1 = sld [smem:[#allocation87_spill]] }
  0x30   : > { %1500 = dma.hbm_to_smem (!%p1498_p6), %s3080_s0, 32, %s1713_s7, [#allocation5]  }
  0x31   : > { %s123_s28 = scalar_lea.vmem [#allocation6], %s1479_s27  ;;  %s1839_s30 = scalar_lea.sflag [#allocation3], %s119_s24 }
  0x32   : > { %s129_s29 = sshll.u32 %s123_s28, 4  ;;  %p1613_p2 = pneg %p1816_p0  ;;  %s1837_s29 = int_to_ptr.vmem [resolvable:$true] %s129_s29 }
  0x35   : > { %s1835_s19 = scalar_lea.hbm %s3081_s1, %s1302_s25  ;;  %s1616_s5 = scalar_lea.hbm %s3081_s1, 3072 }
  0x36   : > { %s1611_s3 = scalar_lea.hbm %s1835_s19, 768  ;;  %p1617_p7 = scmp.lt.u32.totalorder %s1835_s19, %s3081_s1 }
  0x37   : > { %p1612_p1 = scmp.ne.s32.totalorder %s1835_s19, %s1611_s3  ;;  %p1618_p8 = scmp.lt.u32.totalorder %s1616_s5, %s1611_s3 }
  0x38   : > { %p1620_p10 = scmp.lt.u32.totalorder %s1611_s3, %s1835_s19 }
  0x39   : > { %p1614_p6 = pnand %p1613_p2, %p1612_p1  ;;  %p1619_p9 = por %p1618_p8, %p1617_p7 }
  0x3b   : > { %p1615_p3 = pneg %p1614_p6  ;;  %p1621_p5 = por %p1620_p10, %p1619_p9 }
  0x3d   : > { %p1622_p4 = pnand %p1621_p5, %p1615_p3 }
  0x3f   : > { %1625 = shalt.err (!%p1622_p4)
}
  0x40   : > { %s1626_s24 = scalar_lea.vmem %s1837_s29, 768  ;;  %s1714_s27 = smov [#allocation6]  }
  0x41   : > { %p1627_p1 = scmp.ne.s32.totalorder %s1837_s29, %s1626_s24  ;;  %s1631_s8 = sshll.u32 %s1714_s27, 4  ;;  %s1632_s8 = int_to_ptr.vmem [resolvable:$false] %s1631_s8 }
  0x42   : > { %s1633_s14 = scalar_lea.vmem %s1632_s8, 1536  ;;  %p1634_p11 = scmp.lt.s32.totalorder %s1837_s29, %s1632_s8 }
  0x43   : > { %p1629_p6 = pnand %p1627_p1, %p1613_p2  ;;  %p1635_p7 = scmp.lt.s32.totalorder %s1633_s14, %s1626_s24 }
  0x45   : > { %p1630_p12 = pneg %p1629_p6  ;;  %p1636_p8 = por %p1635_p7, %p1634_p11 }
  0x47   : > { %p1637_p9 = pnand %p1636_p8, %p1630_p12 }
  0x49   : > { %1640 = shalt.err (!%p1637_p9)
}
  0x4a   : > { %s1715_s16 = smov 512   ;;  %s1716_s17 = smov 128  }
  0x4b   : > { %s1717_s28 = smov 8   ;;  %141 = sbr.rel (%p1803_p13) target bundleno = 297 (0x129), region = 28 }
  0x4c   : > { %1504 = dma.hbm_to_vmem [thread:$0]  (!%p1816_p0), %s1835_s19, 768, %s1837_s29, %s1839_s30, %s1715_s16, %s1716_s17, %s1717_s28  }
  0x52   : > { %p3082_p4 = scmp.eq.s32.totalorder %s1764_s13, 0 }
  0x54   : > { %1686 = dma.done.wait (%p3082_p4), [#allocation5], 32   ;;  %p3083_p2 = pmov %p3082_p4 }
  0x55   : > { %s1874_s3 = sand.u32 1, %s1703_s10   ;;  %p3086_p11 = scmp.ne.s32.totalorder %s3073_s20, 0 }
  0x56   : > { %1688 = vsyncadd (%p3083_p2), [#allocation5], 4294967264  ;;  %3084 = sst [smem:[#allocation20_spill]] %s1874_s3  ;;  %s1480_s25 = smul.u32 48, %s1874_s3 }
  0x57   : > { %s148_s4 = scalar_lea.sflag [#allocation3], %s1874_s3 }
  0x58   : > { %s1878_s5 = scalar_lea.vmem [#allocation6], %s1480_s25 }
  0x59   : > { %3085 = sst [smem:[#allocation21_spill]] %s1878_s5 }
  0x5a   : > { %1690 = dma.done.wait (%p3086_p11), %s148_s4, 768  }
  0x5b   : > { %1692 = vsyncadd (%p3086_p11), %s148_s4, 4294966528 }
  0x5c   : > { %156 = sfence }
  0x5d   : > { %s1305_s23 = sshll.u32 %s1874_s3, 5  ;;  %v1886_v0 = vld [vmem:[%s1878_s5] sm:$0xff]  ;;  %v1889_v1 = vld [vmem:[%s1878_s5 + $0x8] sm:$0xff]  ;;  %v1892_v2 = vld [vmem:[%s1878_s5 + $0x18] sm:$0xff]  ;;  %v1718_v23 = vmov 683565275  }
  0x5e   : > { %v189_v3 = vand.u32 2147483647, %v1886_v0  ;;  %v1896_v4 = vld [vmem:[%s1878_s5 + $0x10] sm:$0xff]  ;;  %v192_v5 = vand.u32 2139095040, %v1886_v0  ;;  %s1899_s20 = scalar_lea.vmem [#allocation7], %s1305_s23  ;;  %s1952_s26 = sld [smem:[#allocation2]] }
  0x5f   : > { %3087 = sst [smem:[#allocation22_spill]] %s1899_s20  ;;  %1183 = vst [vmem:[%s1899_s20] sm:$0xff] %v1889_v1  ;;  %1473 = vst [vmem:[%s1899_s20 + $0x10] sm:$0xff] %v1892_v2  ;;  %v396_v8 = vand.u32 2147483647, %v1896_v4  ;;  %v399_v9 = vand.u32 2139095040, %v1896_v4  ;;  %s1954_s19 = sld [smem:[#allocation2 + $0x1]] }
  0x60   : > { %v193_v6 = vshrl.u32 %v192_v5, 23  ;;  %v196_v7 = vand.u32 8388607, %v189_v3  ;;  %v1719_v25 = vmov 2475754826   ;;  %s1959_s29 = sld [smem:[#allocation2 + $0x4]] }
  0x61   : > { %v400_v11 = vshrl.u32 %v399_v9, 23  ;;  %v1911_v15 = vand.u32 8388607, %v396_v8  ;;  %v1720_v27 = vmov 2131351028   ;;  %s1961_s30 = sld [smem:[#allocation2 + $0x5]] }
  0x62   : > { %v1311_v10 = vadd.s32 4294967169, %v193_v6  ;;  %v197_v13 = vor.u32 8388608, %v196_v7  ;;  %v1721_v29 = vmov 2102212464   ;;  %v1722_v31 = vmov 920167782  }
  0x63   : > { %v1319_v14 = vadd.s32 4294967169, %v400_v11  ;;  %v404_v21 = vor.u32 8388608, %v1911_v15  ;;  %v1723_v38 = vmov 1326507024   ;;  %s1963_s6 = sld [smem:[#allocation2 + $0x2]]  ;;  %s1965_s7 = sld [smem:[#allocation2 + $0x3]] }
  0x64   : > { %v199_v12 = vadd.s32 1, %v1311_v10  ;;  %v1913_v20 = vshll.u32 %v197_v13, 8  ;;  %3088 = sst [smem:[#allocation23_spill]] %s1952_s26  ;;  %s1967_s24 = sld [smem:[#allocation2 + $0x30]]  ;;  %vm1978_vm11 = vcmp.le.f32.partialorder %v189_v3, 0.7853982 }
  0x65   : > { %v406_v17 = vadd.s32 1, %v1319_v14  ;;  %3089 = sst [smem:[#allocation24_spill]] %s1954_s19  ;;  %s1969_s27 = sld [smem:[#allocation2 + $0x6]]  ;;  %vm191_vm13 = vcmp.lt.s32.totalorder %v1886_v0, 0  ;;  %vm398_vm14 = vcmp.lt.s32.totalorder %v1896_v4, 0 }
  0x66   : > { %vm200_vm0 = vcmp.gt.s32.totalorder %v199_v12, 0  ;;  %s1972_s8 = sld [smem:[#allocation2 + $0x7]]  ;;  %s1974_s14 = sld [smem:[#allocation2 + $0x8]]  ;;  %vm2025_vm15 = vcmp.le.f32.partialorder %v396_v8, 0.7853982 }
  0x67   : > { %v201_v16 = vsel %vm200_vm0, %v199_v12, 0  ;;  %vm407_vm1 = vcmp.gt.s32.totalorder %v406_v17, 0  ;;  %s1986_s16 = sld [smem:[#allocation2 + $0x9]]  ;;  %s1988_s17 = sld [smem:[#allocation2 + $0xa]] }
  0x68   : > { %v202_v18 = vshrl.u32 %v201_v16, 5  ;;  %v203_v19 = vand.u32 31, %v201_v16  ;;  %v408_v43 = vsel %vm407_vm1, %v406_v17, 0  ;;  %s1991_s28 = sld [smem:[#allocation2 + $0xb]]  ;;  %s1993_s25 = sld [smem:[#allocation2 + $0x31]] }
  0x69   : > { %v409_v46 = vshrl.u32 %v408_v43, 5  ;;  %v410_v47 = vand.u32 31, %v408_v43  ;;  %3090 = sst [smem:[#allocation25_spill]] %s1963_s6  ;;  %s1996_s4 = sld [smem:[#allocation2 + $0xc]] }
  0x6a   : > { %v204_v22 = vsub.s32 32, %v203_v19  ;;  %v206_v24 = vshll.u32 %v1718_v23, %v203_v19  ;;  %v209_v26 = vshll.u32 %v1719_v25, %v203_v19  ;;  %v212_v28 = vshll.u32 %v1720_v27, %v203_v19  ;;  %3091 = sst [smem:[#allocation26_spill]] %s1965_s7  ;;  %s1998_s23 = sld [smem:[#allocation2 + $0xd]] }
  0x6b   : > { %v215_v30 = vshll.u32 %v1721_v29, %v203_v19  ;;  %v218_v32 = vshll.u32 %v1722_v31, %v203_v19  ;;  %vm221_vm2 = vcmp.lt.s32.totalorder %v202_v18, 1  ;;  %vm222_vm3 = vcmp.lt.s32.totalorder %v202_v18, 2  ;;  %3092 = sst [smem:[#allocation27_spill]] %s1967_s24  ;;  %s2002_s0 = sld [smem:[#allocation2 + $0xe]] }
  0x6c   : > { %v205_v33 = vshrl.u32 %v1718_v23, %v204_v22  ;;  %v207_v34 = vshrl.u32 %v1719_v25, %v204_v22  ;;  %v210_v35 = vshrl.u32 %v1720_v27, %v204_v22  ;;  %v213_v36 = vshrl.u32 %v1721_v29, %v204_v22  ;;  %3093 = sst [smem:[#allocation28_spill]] %s1969_s27  ;;  %s2004_s1 = sld [smem:[#allocation2 + $0xf]] }
  0x6d   : > { %v216_v37 = vshrl.u32 %v1722_v31, %v204_v22  ;;  %v219_v39 = vshrl.u32 %v1723_v38, %v204_v22  ;;  %vm223_vm4 = vcmp.lt.s32.totalorder %v202_v18, 3  ;;  %vm224_vm5 = vcmp.lt.s32.totalorder %v202_v18, 4  ;;  %3094 = sst [smem:[#allocation29_spill]] %s1972_s8  ;;  %s2010_s18 = sld [smem:[#allocation2 + $0x10]] }
  0x6e   : > { %v208_v40 = vor.u32 %v207_v34, %v206_v24  ;;  %v211_v41 = vor.u32 %v210_v35, %v209_v26  ;;  %v214_v42 = vor.u32 %v213_v36, %v212_v28  ;;  %v411_v55 = vsub.s32 32, %v410_v47  ;;  %3095 = sst [smem:[#allocation30_spill]] %s1974_s14  ;;  %s2012_s11 = sld [smem:[#allocation2 + $0x11]] }
  0x6f   : > { %v217_v44 = vor.u32 %v216_v37, %v215_v30  ;;  %v220_v45 = vor.u32 %v219_v39, %v218_v32  ;;  %v413_v59 = vshll.u32 %v1718_v23, %v410_v47  ;;  %v416_v11 = vshll.u32 %v1719_v25, %v410_v47  ;;  %3098 = sst [smem:[#allocation31_spill]] %s1986_s16  ;;  %s2019_s10 = sld [smem:[#allocation2 + $0x32]] }
  0x70   : > { %v225_v48 = vsel %vm221_vm2, %v205_v33, %v208_v40  ;;  %v226_v49 = vsel %vm224_vm5, %v214_v42, 2102212464  ;;  %v229_v50 = vsel %vm221_vm2, %v208_v40, %v211_v41  ;;  %v233_v51 = vsel %vm221_vm2, %v211_v41, %v214_v42  ;;  %3099 = sst [smem:[#allocation32_spill]] %s1993_s25  ;;  %s2021_s15 = sld [smem:[#allocation2 + $0x12]] }
  0x71   : > { %v227_v52 = vsel %vm223_vm4, %v211_v41, %v226_v49  ;;  %v230_v53 = vsel %vm224_vm5, %v217_v44, 920167782  ;;  %v234_v54 = vsel %vm224_vm5, %v220_v45, 1326507024  ;;  %v412_v63 = vshrl.u32 %v1718_v23, %v411_v55  ;;  %3100 = sst [smem:[#allocation33_spill]] %s1996_s4  ;;  %s2043_s22 = sld [smem:[#allocation2 + $0x15]] }
  0x72   : > { %v228_v56 = vsel %vm222_vm3, %v225_v48, %v227_v52  ;;  %v231_v57 = vsel %vm223_vm4, %v214_v42, %v230_v53  ;;  %v235_v58 = vsel %vm223_vm4, %v217_v44, %v234_v54  ;;  %v414_v10 = vshrl.u32 %v1719_v25, %v411_v55  ;;  %3101 = sst [smem:[#allocation34_spill]] %s1998_s23  ;;  %s2045_s9 = sld [smem:[#allocation2 + $0x16]] }
  0x73   : > { %v232_v60 = vsel %vm222_vm3, %v229_v50, %v231_v57  ;;  %v236_v61 = vsel %vm222_vm3, %v233_v51, %v235_v58  ;;  %v244_v62 = vmul.u32 %v1913_v20, %v228_v56  ;;  %v417_v12 = vshrl.u32 %v1720_v27, %v411_v55  ;;  %3102 = sst [smem:[#allocation35_spill]] %s2002_s0  ;;  %s2051_s12 = sld [smem:[#allocation2 + $0x17]] }
  0x74   : > { %v1928_v5 = vmul.u32.u64.low %v1913_v20, %v236_v61  ;;  %v1929_v6 = vmul.u32.u64.high %v1913_v20, %v236_v61, %v1928_v5  ;;  %v1932_v7 = vmul.u32.u64.low %v1913_v20, %v232_v60  ;;  %v1933_v9 = vmul.u32.u64.high %v1913_v20, %v232_v60, %v1932_v7  ;;  %3103 = sst [smem:[#allocation36_spill]] %s2004_s1  ;;  %s2053_s2 = sld [smem:[#allocation2 + $0x33]] }
  0x75   : > { %v419_v13 = vshll.u32 %v1720_v27, %v410_v47  ;;  %v420_v14 = vshrl.u32 %v1721_v29, %v411_v55  ;;  %v422_v16 = vshll.u32 %v1721_v29, %v410_v47  ;;  %v423_v17 = vshrl.u32 %v1722_v31, %v411_v55  ;;  %3104 = sst [smem:[#allocation37_spill]] %s2019_s10  ;;  %s2057_s21 = sld [smem:[#allocation2 + $0x18]] }
  0x76   : > { %v425_v18 = vshll.u32 %v1722_v31, %v410_v47  ;;  %v415_v19 = vor.u32 %v414_v10, %v413_v59  ;;  %v418_v22 = vor.u32 %v417_v12, %v416_v11  ;;  %v426_v23 = vshrl.u32 %v1723_v38, %v411_v55  ;;  %3105 = sst [smem:[#allocation38_spill]] %s2021_s15  ;;  %s2059_s3 = sld [smem:[#allocation2 + $0x19]] }
  0x77   : > { %vm428_vm6 = vcmp.lt.s32.totalorder %v409_v46, 1  ;;  %vm246_vm7 = vc.u32 %v1929_v6, %v1932_v7  ;;  %v247_v24 = vadd.s32 1, %v1933_v9  ;;  %v421_v20 = vor.u32 %v420_v14, %v419_v13  ;;  %3110 = sst [smem:[#allocation41_spill]] %s2043_s22  ;;  %s2070_s20 = sld [smem:[#allocation2 + $0x1b]] }
  0x78   : > { %v444_v26 = vshll.u32 %v404_v21, 8  ;;  %v424_v25 = vor.u32 %v423_v17, %v422_v16  ;;  %v427_v28 = vor.u32 %v426_v23, %v425_v18  ;;  %vm429_vm8 = vcmp.lt.s32.totalorder %v409_v46, 2  ;;  %s2077_s13 = sld [smem:[#allocation2 + $0x1c]]  ;;  %s2079_s5 = sld [smem:[#allocation2 + $0x1d]] }
  0x79   : > { %vm430_vm9 = vcmp.lt.s32.totalorder %v409_v46, 3  ;;  %v248_v27 = vsel %vm246_vm7, %v247_v24, %v1933_v9  ;;  %vm431_vm10 = vcmp.lt.s32.totalorder %v409_v46, 4  ;;  %v432_v29 = vsel %vm428_vm6, %v412_v63, %v415_v19  ;;  %s2156_s10 = sld [smem:[#allocation2 + $0x2c]] }
  0x7a   : > { %v436_v30 = vsel %vm428_vm6, %v415_v19, %v418_v22  ;;  %v249_v31 = vadd.s32 %v248_v27, %v244_v62  ;;  %v433_v32 = vsel %vm431_vm10, %v421_v20, 2102212464  ;;  %v437_v33 = vsel %vm431_vm10, %v424_v25, 920167782  ;;  %3111 = sst [smem:[#allocation42_spill]] %s2053_s2 }
  0x7b   : > { %v440_v34 = vsel %vm428_vm6, %v418_v22, %v421_v20  ;;  %v434_v35 = vsel %vm430_vm9, %v418_v22, %v433_v32  ;;  %v438_v36 = vsel %vm430_vm9, %v421_v20, %v437_v33  ;;  %v441_v15 = vsel %vm431_vm10, %v427_v28, 1326507024  ;;  %3112 = sst [smem:[#allocation43_spill]] %s2057_s21  ;;  %s2169_s2 = sld [smem:[#allocation2 + $0x37]] }
  0x7c   : > { %v250_v21 = vadd.s32 536870912, %v249_v31  ;;  %v439_v37 = vsel %vm429_vm8, %v436_v30, %v438_v36  ;;  %v442_v38 = vsel %vm430_vm9, %v424_v25, %v441_v15  ;;  %v435_v39 = vsel %vm429_vm8, %v432_v29, %v434_v35  ;;  %3113 = sst [smem:[#allocation44_spill]] %s2059_s3 }
  0x7d   : > { %v443_v40 = vsel %vm429_vm8, %v440_v34, %v442_v38  ;;  %v1948_v41 = vmul.u32.u64.low %v444_v26, %v439_v37  ;;  %v1949_v42 = vmul.u32.u64.high %v444_v26, %v439_v37, %v1948_v41  ;;  %v451_v47 = vmul.u32 %v444_v26, %v435_v39  ;;  %3115 = sst [smem:[#allocation46_spill]] %s2070_s20 }
  0x7e   : > { %v251_v43 = vshrl.u32 %v250_v21, 30  ;;  %v1956_v44 = vmul.u32.u64.low %v444_v26, %v443_v40  ;;  %v1957_v45 = vmul.u32.u64.high %v444_v26, %v443_v40, %v1956_v44  ;;  %v620_v55 = vstv %s1952_s26  ;;  %s2187_s26 = sld [smem:[#allocation2 + $0x3c]] }
  0x7f   : > { %v454_v48 = vadd.s32 1, %v1949_v42  ;;  %v635_v56 = vstv %s1959_s29  ;;  %v639_v57 = vstv %s1961_s30  ;;  %v245_v58 = vadd.s32 %v1932_v7, %v1929_v6  ;;  %s2032_s29 = sld [smem:[#allocation2 + $0x13]]  ;;  %s2034_s30 = sld [smem:[#allocation2 + $0x14]] }
  0x80   : > { %v252_v46 = vshll.u32 %v251_v43, 30  ;;  %vm453_vm12 = vc.u32 %v1957_v45, %v1948_v41  ;;  %v275_v51 = vsub.s32 4, %v251_v43  ;;  %v623_v61 = vstv %s1954_s19  ;;  %3127 = sst [smem:[#allocation58_spill]] %s2156_s10  ;;  %s2178_s19 = sld [smem:[#allocation2 + $0x3a]] }
  0x81   : > { %v455_v52 = vsel %vm453_vm12, %v454_v48, %v1949_v42  ;;  %v627_v5 = vstv %s1963_s6  ;;  %v631_v6 = vstv %s1965_s7  ;;  %v643_v7 = vstv %s1967_s24  ;;  %s2086_s24 = sld [smem:[#allocation2 + $0x1e]]  ;;  %s2100_s7 = sld [smem:[#allocation2 + $0x21]] }
  0x82   : > { %v1982_v50 = vsub.s32 %v249_v31, %v252_v46  ;;  %v456_v53 = vadd.s32 %v455_v52, %v451_v47  ;;  %v276_v59 = vsel %vm191_vm13, %v275_v51, %v251_v43  ;;  %v2037_v10 = vmul.f32 %v1889_v1, %v635_v56  ;;  %s2102_s6 = sld [smem:[#allocation2 + $0x22]]  ;;  %3129 = sst [smem:[#allocation60_spill]] %s2169_s2 }
  0x83   : > { %v2040_v11 = vmul.f32 %v1892_v2, %v639_v57  ;;  %v647_v8 = vstv %s1969_s27  ;;  %v278_v13 = vsel %vm1978_vm11, 0, %v276_v59  ;;  %v650_v14 = vstv %s1972_s8  ;;  %s2137_s8 = sld [smem:[#allocation2 + $0x29]]  ;;  %s2139_s27 = sld [smem:[#allocation2 + $0x36]] }
  0x84   : > { %v255_v3 = vsub.s32 0, %v1982_v50  ;;  %v457_v60 = vadd.s32 536870912, %v456_v53  ;;  %v662_v16 = vstv %s1988_s17  ;;  %v654_v19 = vstv %s1974_s14  ;;  %s2068_s17 = sld [smem:[#allocation2 + $0x1a]]  ;;  %s2096_s14 = sld [smem:[#allocation2 + $0x20]] }
  0x85   : > { %3108 = sst [smem:[#allocation39_spill]] %s2032_s29  ;;  %v658_v22 = vstv %s1986_s16  ;;  %v2061_v23 = vand.u32 3, %v278_v13  ;;  %v2065_v24 = vadd.s32 %v1948_v41, %v1957_v45  ;;  %v666_v20 = vstv %s1991_s28  ;;  %s2094_s16 = sld [smem:[#allocation2 + $0x1f]] }
  0x86   : > { %v1312_v54 = vmin.u32 %v255_v3, %v1982_v50  ;;  %3109 = sst [smem:[#allocation40_spill]] %s2034_s30  ;;  %v458_v9 = vshrl.u32 %v457_v60, 30  ;;  %v385_v25 = vadd.s32 3, %v278_v13  ;;  %v2075_v27 = vmul.f32 %v1889_v1, %v662_v16  ;;  %s2084_s28 = sld [smem:[#allocation2 + $0x34]] }
  0x87   : > { %3117 = sst [smem:[#allocation48_spill]] %s2086_s24  ;;  %v2090_v34 = vmul.f32 %v1892_v2, %v666_v20  ;;  %v670_v35 = vstv %s1993_s25  ;;  %v674_v36 = vstv %s1996_s4  ;;  %v689_v37 = vstv %s2010_s18  ;;  %s2110_s25 = sld [smem:[#allocation2 + $0x23]] }
  0x88   : > { %v257_v62 = vclz %v1312_v54  ;;  %v459_v17 = vshll.u32 %v458_v9, 30  ;;  %v482_v18 = vsub.s32 4, %v458_v9  ;;  %v693_v38 = vstv %s2012_s11  ;;  %3119 = sst [smem:[#allocation50_spill]] %s2100_s7  ;;  %s2112_s4 = sld [smem:[#allocation2 + $0x35]] }
  0x89   : > { %v2104_v39 = vand.u32 3, %v385_v25  ;;  %v677_v42 = vstv %s1998_s23  ;;  %v681_v45 = vstv %s2002_s0  ;;  %v685_v46 = vstv %s2004_s1  ;;  %s2116_s11 = sld [smem:[#allocation2 + $0x24]]  ;;  %s2118_s18 = sld [smem:[#allocation2 + $0x25]] }
  0x8a   : > { %v1313_v12 = vadd.s32 4294967294, %v257_v62  ;;  %3114 = sst [smem:[#allocation45_spill]] %s2068_s17  ;;  %v2072_v28 = vsub.s32 %v456_v53, %v459_v17  ;;  %v483_v32 = vsel %vm398_vm14, %v482_v18, %v458_v9  ;;  %v2121_v48 = vmul.f32 %v1889_v1, %v689_v37  ;;  %s2127_s23 = sld [smem:[#allocation2 + $0x26]] }
  0x8b   : > { %3118 = sst [smem:[#allocation49_spill]] %s2096_s14  ;;  %v485_v41 = vsel %vm2025_vm15, 0, %v483_v32  ;;  %v716_v51 = vstv %s2045_s9  ;;  %s2129_s0 = sld [smem:[#allocation2 + $0x27]]  ;;  %v720_v54 = vstv %s2051_s12  ;;  %v704_v59 = vstv %s2032_s29 }
  0x8c   : > { %vm1314_vm0 = vcmp.lt.s32.totalorder %v1313_v12, 0  ;;  %3116 = sst [smem:[#allocation47_spill]] %s2084_s28  ;;  %v462_v33 = vsub.s32 0, %v2072_v28  ;;  %v592_v53 = vadd.s32 3, %v485_v41  ;;  %s2132_s1 = sld [smem:[#allocation2 + $0x28]]  ;;  %v708_v62 = vstv %s2034_s30 }
  0x8d   : > { %v260_v26 = vsel %vm1314_vm0, 0, %v1313_v12  ;;  %3124 = sst [smem:[#allocation55_spill]] %s2139_s27  ;;  %v712_v9 = vstv %s2043_s22  ;;  %v2144_v12 = vmul.f32 %v1889_v1, %v716_v51  ;;  %s2146_s9 = sld [smem:[#allocation2 + $0x2a]]  ;;  %v2150_v13 = vand.u32 3, %v485_v41 }
  0x8e   : > { %v261_v29 = vsub.s32 32, %v260_v26  ;;  %v262_v30 = vshll.u32 %v1982_v50, %v260_v26  ;;  %v265_v31 = vsub.s32 4294967266, %v260_v26  ;;  %v1320_v40 = vmin.u32 %v462_v33, %v2072_v28  ;;  %3120 = sst [smem:[#allocation51_spill]] %s2112_s4  ;;  %s2148_s12 = sld [smem:[#allocation2 + $0x2b]] }
  0x8f   : > { %3121 = sst [smem:[#allocation52_spill]] %s2118_s18  ;;  %v2124_v50 = vmul.f32 %v1892_v2, %v693_v38  ;;  %v2153_v16 = vmul.f32 %v1892_v2, %v720_v54  ;;  %s2158_s22 = sld [smem:[#allocation2 + $0x2d]]  ;;  %v2160_v26 = vand.u32 3, %v592_v53  ;;  %v743_v25 = vstv %s2077_s13 }
  0x90   : > { %v263_v15 = vshrl.u32 %v245_v58, %v261_v29  ;;  %v266_v21 = vadd.s32 127, %v265_v31  ;;  %v464_v47 = vclz %v1320_v40  ;;  %3122 = sst [smem:[#allocation53_spill]] %s2127_s23  ;;  %v701_v58 = vstv %s2021_s15  ;;  %s2163_s30 = sld [smem:[#allocation2 + $0x2e]] }
  0x91   : > { %3123 = sst [smem:[#allocation54_spill]] %s2129_s0  ;;  %s2165_s29 = sld [smem:[#allocation2 + $0x2f]]  ;;  %v747_v32 = vstv %s2079_s5  ;;  %v735_v37 = vstv %s2068_s17  ;;  %v739_v40 = vstv %s2070_s20  ;;  %v2183_v41 = vmul.f32 %v1889_v1, %v743_v25 }
  0x92   : > { %v264_v43 = vor.u32 %v263_v15, %v262_v30  ;;  %v267_v44 = vshll.u32 %v266_v21, 23  ;;  %v1321_v56 = vadd.s32 4294967294, %v464_v47  ;;  %s2171_s15 = sld [smem:[#allocation2 + $0x38]]  ;;  %v728_v15 = vstv %s2057_s21  ;;  %s2176_s13 = sld [smem:[#allocation2 + $0x39]] }
  0x93   : > { %3125 = sst [smem:[#allocation56_spill]] %s2146_s9  ;;  %v731_v21 = vstv %s2059_s3  ;;  %s2185_s5 = sld [smem:[#allocation2 + $0x3b]]  ;;  %v770_v53 = vstv %s2102_s6  ;;  %v758_v54 = vstv %s2094_s16  ;;  %vm287_vm2 = vcmp.eq.s32.totalorder %v2061_v23, 2 }
  0x94   : > { %v268_v52 = vor.u32 4788187, %v267_v44  ;;  %v271_v3 = vcvt.s32.f32 %v264_v43  ;;  %3126 = sst [smem:[#allocation57_spill]] %s2148_s12  ;;  %vm1322_vm1 = vcmp.lt.s32.totalorder %v1321_v56, 0  ;;  %v2192_v44 = vmul.f32 %v1892_v2, %v747_v32  ;;  %s2196_s17 = sld [smem:[#allocation2 + $0x3d]] }
  0x95   : > { %3128 = sst [smem:[#allocation59_spill]] %s2158_s22  ;;  %v467_v20 = vsel %vm1322_vm1, 0, %v1321_v56  ;;  %s2198_s20 = sld [smem:[#allocation2 + $0x3e]]  ;;  %v762_v56 = vstv %s2096_s14  ;;  %vm391_vm3 = vcmp.eq.s32.totalorder %v2104_v39, 2  ;;  %v2223_v25 = vmul.f32 %v1889_v1, %v770_v53 }
  0x96   : > { %v269_v60 = vand.u32 2147483647, %v268_v52  ;;  %v468_v29 = vsub.s32 32, %v467_v20  ;;  %v469_v30 = vshll.u32 %v2072_v28, %v467_v20  ;;  %v472_v31 = vsub.s32 4294967266, %v467_v20  ;;  %3131 = sst [smem:[#allocation62_spill]] %s2187_s26  ;;  %s2204_s3 = sld [smem:[#allocation2 + $0x3f]] }
  0x97   : > { %s2206_s21 = sld [smem:[#allocation2 + $0x78]]  ;;  %v766_v20 = vstv %s2100_s7  ;;  %s2216_s6 = sld [smem:[#allocation2 + $0x42]]  ;;  %vm284_vm4 = vcmp.eq.s32.totalorder %v2061_v23, 0  ;;  %vm388_vm5 = vcmp.eq.s32.totalorder %v2104_v39, 0  ;;  %vm283_vm6 = vcmp.lt.s32.totalorder %v2061_v23, 2 }
  0x98   : > { %v272_v18 = vmul.f32 %v271_v3, %v269_v60  ;;  %v470_v38 = vshrl.u32 %v2065_v24, %v468_v29  ;;  %v473_v28 = vadd.s32 127, %v472_v31  ;;  %v755_v24 = vstv %s2086_s24  ;;  %s2211_s28 = sld [smem:[#allocation2 + $0x40]]  ;;  %s2213_s24 = sld [smem:[#allocation2 + $0x41]] }
  0x99   : > { %3130 = sst [smem:[#allocation61_spill]] %s2185_s5  ;;  %v774_v60 = vstv %s2110_s25  ;;  %v797_v31 = vstv %s2132_s1  ;;  %s2228_s25 = sld [smem:[#allocation2 + $0x44]]  ;;  %vm387_vm7 = vcmp.lt.s32.totalorder %v2104_v39, 2  ;;  %vm281_vm8 = vweird.f32 %v1886_v0 }
  0x9a   : > { %v273_v33 = vxor.u32 2147483648, %v272_v18  ;;  %3132 = sst [smem:[#allocation63_spill]] %s2196_s17  ;;  %v471_v52 = vor.u32 %v470_v38, %v469_v30  ;;  %v474_v3 = vshll.u32 %v473_v28, 23  ;;  %v782_v30 = vstv %s2116_s11  ;;  %s2230_s7 = sld [smem:[#allocation2 + $0x45]] }
  0x9b   : > { %3133 = sst [smem:[#allocation64_spill]] %s2198_s20  ;;  %v785_v38 = vstv %s2118_s18  ;;  %v801_v28 = vstv %s2137_s8  ;;  %s2239_s4 = sld [smem:[#allocation2 + $0x46]]  ;;  %v809_v29 = vstv %s2146_s9  ;;  %v812_v17 = vstv %s2148_s12 }
  0x9c   : > { %v274_v43 = vsel %vm191_vm13, %v273_v33, %v272_v18  ;;  %3134 = sst [smem:[#allocation65_spill]] %s2204_s3  ;;  %v475_v49 = vor.u32 4788187, %v474_v3  ;;  %v478_v18 = vcvt.s32.f32 %v471_v52  ;;  %v2235_v33 = vmul.f32 %v1892_v2, %v774_v60  ;;  %s2241_s1 = sld [smem:[#allocation2 + $0x47]] }
  0x9d   : > { %v277_v51 = vsel %vm1978_vm11, %v1886_v0, %v274_v43  ;;  %3135 = sst [smem:[#allocation66_spill]] %s2206_s21  ;;  %s2218_s21 = sld [smem:[#allocation2 + $0x43]]  ;;  %v824_v52 = vstv %s2163_s30  ;;  %v828_v3 = vstv %s2165_s29  ;;  %v2255_v60 = vmul.f32 %v1889_v1, %v797_v31 }
  0x9e   : > { %1558 = vcosq.f32 %v277_v51  ;;  %3136 = sst [smem:[#allocation67_spill]] %s2216_s6  ;;  %v476_v32 = vand.u32 2147483647, %v475_v49  ;;  %s2249_s14 = sld [smem:[#allocation2 + $0x79]]  ;;  %v2264_v47 = vmul.f32 %v1892_v2, %v801_v28  ;;  %v2274_v31 = vmul.f32 %v1889_v1, %v824_v52 }
  0x9f   : > { %1560 = vsinq.f32 %v277_v51  ;;  %3138 = sst [smem:[#allocation69_spill]] %s2228_s25  ;;  %s2251_s18 = sld [smem:[#allocation2 + $0x48]]  ;;  %v871_v49 = vstv %s2211_s28  ;;  %vm494_vm9 = vcmp.eq.s32.totalorder %v2150_v13, 2  ;;  %vm598_vm10 = vcmp.eq.s32.totalorder %v2160_v26, 2 }
  0xa0   : > { %3139 = sst [smem:[#allocation70_spill]] %s2230_s7  ;;  %v479_v53 = vmul.f32 %v478_v18, %v476_v32  ;;  %s2259_s8 = sld [smem:[#allocation2 + $0x49]]  ;;  %v2277_v32 = vmul.f32 %v1892_v2, %v828_v3  ;;  %vm491_vm11 = vcmp.eq.s32.totalorder %v2150_v13, 0  ;;  %vm595_vm12 = vcmp.eq.s32.totalorder %v2160_v26, 0 }
  0xa1   : > { %3140 = sst [smem:[#allocation71_spill]] %s2239_s4  ;;  %s2261_s30 = sld [smem:[#allocation2 + $0x4a]]  ;;  %vm490_vm13 = vcmp.lt.s32.totalorder %v2150_v13, 2 }
  0xa2   : > { %3141 = sst [smem:[#allocation72_spill]] %s2241_s1  ;;  %s2269_s29 = sld [smem:[#allocation2 + $0x4b]]  ;;  %v480_v18 = vxor.u32 2147483648, %v479_v53 }
  0xa3   : > { %3137 = sst [smem:[#allocation68_spill]] %s2218_s21  ;;  %s2271_s27 = sld [smem:[#allocation2 + $0x4c]] }
  0xa4   : > { %3142 = sst [smem:[#allocation73_spill]] %s2249_s14  ;;  %s2280_s0 = sld [smem:[#allocation2 + $0x4d]]  ;;  %v481_v1 = vsel %vm398_vm14, %v480_v18, %v479_v53  ;;  %vm594_vm14 = vcmp.lt.s32.totalorder %v2160_v26, 2 }
  0xa5   : > { %s2282_s10 = sld [smem:[#allocation2 + $0x4e]]  ;;  %s2288_s23 = sld [smem:[#allocation2 + $0x4f]]  ;;  %v484_v57 = vsel %vm2025_vm15, %v1896_v4, %v481_v1  ;;  %vm488_vm15 = vweird.f32 %v1896_v4 }
  0xa6   : > { %s2290_s12 = sld [smem:[#allocation2 + $0x7a]]  ;;  %s2297_s2 = sld [smem:[#allocation2 + $0x50]]  ;;  %1562 = vcosq.f32 %v484_v57 }
  0xa7   : > { %s2299_s9 = sld [smem:[#allocation2 + $0x51]]  ;;  %s2307_s5 = sld [smem:[#allocation2 + $0x52]]  ;;  %1564 = vsinq.f32 %v484_v57 }
  0xa8   : > { %3143 = sst [smem:[#allocation74_spill]] %s2269_s29  ;;  %v1559_v28 = vpop.eup %1558  ;;  %s2309_s26 = sld [smem:[#allocation2 + $0x53]] }
  0xa9   : > { %3144 = sst [smem:[#allocation75_spill]] %s2271_s27  ;;  %v1561_v53 = vpop.eup %1560  ;;  %v288_v18 = vxor.u32 2147483648, %v1559_v28  ;;  %s2313_s20 = sld [smem:[#allocation2 + $0x54]] }
  0xaa   : > { %3145 = sst [smem:[#allocation76_spill]] %s2280_s0  ;;  %s2315_s17 = sld [smem:[#allocation2 + $0x55]]  ;;  %v285_v63 = vxor.u32 2147483648, %v1561_v53 }
  0xab   : > { %3146 = sst [smem:[#allocation77_spill]] %s2282_s10  ;;  %s2319_s22 = sld [smem:[#allocation2 + $0x56]]  ;;  %v289_v51 = vsel %vm287_vm2, %v288_v18, %v1561_v53  ;;  %v393_v2 = vsel %vm391_vm3, %v288_v18, %v1561_v53 }
  0xac   : > { %3148 = sst [smem:[#allocation78_spill]] %s2288_s23  ;;  %s2321_s3 = sld [smem:[#allocation2 + $0x57]]  ;;  %v286_v43 = vsel %vm284_vm4, %v1559_v28, %v285_v63  ;;  %v390_v1 = vsel %vm388_vm5, %v1559_v28, %v285_v63  ;;  %v906_v28 = vstv %s2251_s18 }
  0xad   : > { %3149 = sst [smem:[#allocation79_spill]] %s2290_s12  ;;  %v290_v52 = vsel %vm283_vm6, %v286_v43, %v289_v51  ;;  %v394_v57 = vsel %vm387_vm7, %v390_v1, %v393_v2  ;;  %s2380_s10 = sld [smem:[#allocation2 + $0x7b]] }
  0xae   : > { %3150 = sst [smem:[#allocation80_spill]] %s2307_s5  ;;  %v2349_v23 = vsel %vm281_vm8, nan, %v290_v52  ;;  %v2353_v39 = vsel %vm281_vm8, nan, %v394_v57  ;;  %s2382_s12 = sld [smem:[#allocation2 + $0x58]] }
  0xaf   : > { %3151 = sst [smem:[#allocation81_spill]] %s2309_s26  ;;  %v621_v52 = vmul.f32 %v620_v55, %v2349_v23  ;;  %v624_v0 = vmul.f32 %v623_v61, %v2353_v39  ;;  %v648_v53 = vmul.f32 %v647_v8, %v2349_v23  ;;  %v651_v57 = vmul.f32 %v650_v14, %v2353_v39  ;;  %s2402_s1 = sld [smem:[#allocation2 + $0x59]] }
  0xb0   : > { %3152 = sst [smem:[#allocation82_spill]] %s2313_s20  ;;  %v1563_v61 = vpop.eup %1562  ;;  %v675_v2 = vmul.f32 %v674_v36, %v2349_v23  ;;  %v678_v8 = vmul.f32 %v677_v42, %v2353_v39  ;;  %v702_v55 = vmul.f32 %v701_v58, %v2349_v23  ;;  %v705_v3 = vmul.f32 %v704_v59, %v2353_v39  ;;  %s2413_s25 = sld [smem:[#allocation2 + $0x5a]] }
  0xb1   : > { %3153 = sst [smem:[#allocation83_spill]] %s2315_s17  ;;  %v1565_v1 = vpop.eup %1564  ;;  %v495_v18 = vxor.u32 2147483648, %v1563_v61  ;;  %v625_v51 = vadd.f32 %v624_v0, %v621_v52  ;;  %v729_v14 = vmul.f32 %v728_v15, %v2349_v23  ;;  %v732_v43 = vmul.f32 %v731_v21, %v2353_v39  ;;  %s2425_s23 = sld [smem:[#allocation2 + $0x5b]] }
  0xb2   : > { %3154 = sst [smem:[#allocation84_spill]] %s2319_s22  ;;  %v492_v36 = vxor.u32 2147483648, %v1565_v1  ;;  %v756_v42 = vmul.f32 %v755_v24, %v2349_v23  ;;  %v759_v58 = vmul.f32 %v758_v54, %v2353_v39  ;;  %v783_v52 = vmul.f32 %v782_v30, %v2349_v23  ;;  %s2427_s29 = sld [smem:[#allocation2 + $0x5c]] }
  0xb3   : > { %3155 = sst [smem:[#allocation85_spill]] %s2321_s3  ;;  %v496_v59 = vsel %vm494_vm9, %v495_v18, %v1565_v1  ;;  %v600_v15 = vsel %vm598_vm10, %v495_v18, %v1565_v1  ;;  %v786_v21 = vmul.f32 %v785_v38, %v2353_v39  ;;  %v652_v0 = vadd.f32 %v651_v57, %v648_v53  ;;  %s2443_s14 = sld [smem:[#allocation2 + $0x5d]] }
  0xb4   : > { %3167 = sst [smem:[#allocation23_spill]] %s2380_s10  ;;  %v493_v24 = vsel %vm491_vm11, %v1563_v61, %v492_v36  ;;  %v597_v54 = vsel %vm595_vm12, %v1563_v61, %v492_v36  ;;  %v679_v18 = vadd.f32 %v678_v8, %v675_v2  ;;  %v810_v1 = vmul.f32 %v809_v29, %v2349_v23  ;;  %s2445_s22 = sld [smem:[#allocation2 + $0x5e]] }
  0xb5   : > { %3168 = sst [smem:[#allocation24_spill]] %s2382_s12  ;;  %v497_v30 = vsel %vm490_vm13, %v493_v24, %v496_v59  ;;  %v601_v38 = vsel %vm594_vm14, %v597_v54, %v600_v15  ;;  %v813_v63 = vmul.f32 %v812_v17, %v2353_v39  ;;  %v706_v29 = vadd.f32 %v705_v3, %v702_v55  ;;  %s2459_s20 = sld [smem:[#allocation2 + $0x5f]] }
  0xb6   : > { %3170 = sst [smem:[#allocation28_spill]] %s2402_s1  ;;  %v2449_v13 = vsel %vm488_vm15, nan, %v497_v30  ;;  %v2453_v26 = vsel %vm488_vm15, nan, %v601_v38  ;;  %v733_v53 = vadd.f32 %v732_v43, %v729_v14  ;;  %v760_v2 = vadd.f32 %v759_v58, %v756_v42  ;;  %s2461_s0 = sld [smem:[#allocation2 + $0x7c]] }
  0xb7   : > { %3173 = sst [smem:[#allocation29_spill]] %s2413_s25  ;;  %v2455_v17 = vadd.f32 %v786_v21, %v783_v52  ;;  %v972_v57 = vstv %s2380_s10  ;;  %v976_v61 = vstv %s2382_s12  ;;  %v628_v4 = vmul.f32 %v627_v5, %v2449_v13  ;;  %s2503_s17 = sld [smem:[#allocation2 + $0x60]] }
  0xb8   : > { %3174 = sst [smem:[#allocation33_spill]] %s2425_s23  ;;  %v632_v3 = vmul.f32 %v631_v6, %v2453_v26  ;;  %v655_v43 = vmul.f32 %v654_v19, %v2449_v13  ;;  %v659_v55 = vmul.f32 %v658_v22, %v2453_v26  ;;  %v682_v8 = vmul.f32 %v681_v45, %v2449_v13  ;;  %s2511_s11 = sld [smem:[#allocation2 + $0x61]] }
  0xb9   : > { %3175 = sst [smem:[#allocation34_spill]] %s2427_s29  ;;  %v686_v14 = vmul.f32 %v685_v46, %v2453_v26  ;;  %v2481_v36 = vadd.f32 %v813_v63, %v810_v1  ;;  %v979_v5 = vstv %s2402_s1  ;;  %v629_v6 = vadd.f32 %v628_v4, %v625_v51  ;;  %s2513_s4 = sld [smem:[#allocation2 + $0x62]] }
  0xba   : > { %3180 = sst [smem:[#allocation38_spill]] %s2443_s14  ;;  %v656_v42 = vadd.f32 %v655_v43, %v652_v0  ;;  %v709_v19 = vmul.f32 %v708_v62, %v2449_v13  ;;  %v713_v22 = vmul.f32 %v712_v9, %v2453_v26  ;;  %v683_v58 = vadd.f32 %v682_v8, %v679_v18  ;;  %s3194_s7 = sld [smem:[#allocation37_spill]] }
  0xbb   : > { %3182 = sst [smem:[#allocation39_spill]] %s2445_s22  ;;  %v983_v59 = vstv %s2413_s25  ;;  %v987_v45 = vstv %s2425_s23  ;;  %v991_v15 = vstv %s2427_s29  ;;  %v633_v46 = vadd.f32 %v632_v3, %v629_v6  ;;  %s2518_s21 = sld [smem:[#allocation2 + $0x63]] }
  0xbc   : > { %3186 = sst [smem:[#allocation43_spill]] %s2459_s20  ;;  %v660_v63 = vadd.f32 %v659_v55, %v656_v42  ;;  %v710_v52 = vadd.f32 %v709_v19, %v706_v29  ;;  %v736_v51 = vmul.f32 %v735_v37, %v2449_v13  ;;  %v687_v21 = vadd.f32 %v686_v14, %v683_v58  ;;  %s3195_s6 = sld [smem:[#allocation53_spill]] }
  0xbd   : > { %3187 = sst [smem:[#allocation44_spill]] %s2461_s0  ;;  %v740_v62 = vmul.f32 %v739_v40, %v2453_v26  ;;  %v995_v24 = vstv %s2443_s14  ;;  %v999_v54 = vstv %s2445_s22  ;;  %v637_v9 = vadd.f32 %v2037_v10, %v633_v46  ;;  %s2520_s3 = sld [smem:[#allocation2 + $0x64]] }
  0xbe   : > { %v664_v0 = vadd.f32 %v2075_v27, %v660_v63  ;;  %v714_v18 = vadd.f32 %v713_v22, %v710_v52  ;;  %v737_v30 = vadd.f32 %v736_v51, %v733_v53  ;;  %v691_v38 = vadd.f32 %v2121_v48, %v687_v21  ;;  %s2530_s22 = sld [smem:[#allocation2 + $0x65]]  ;;  %s2532_s14 = sld [smem:[#allocation2 + $0x66]] }
  0xbf   : > { %v763_v37 = vmul.f32 %v762_v56, %v2449_v13  ;;  %v1003_v1 = vstv %s2459_s20  ;;  %v1007_v29 = vstv %s2461_s0  ;;  %v641_v10 = vadd.f32 %v2040_v11, %v637_v9  ;;  %s3196_s0 = sld [smem:[#allocation54_spill]]  ;;  %s3197_s20 = sld [smem:[#allocation42_spill]] }
  0xc0   : > { %v668_v27 = vadd.f32 %v2090_v34, %v664_v0  ;;  %v718_v40 = vadd.f32 %v2144_v12, %v714_v18  ;;  %v741_v53 = vadd.f32 %v740_v62, %v737_v30  ;;  %v2524_v48 = vmul.f32 %v2449_v13, %v2349_v23  ;;  %s3198_s29 = sld [smem:[#allocation58_spill]]  ;;  %s2542_s25 = sld [smem:[#allocation2 + $0x7d]] }
  0xc1   : > { %v695_v56 = vadd.f32 %v2124_v50, %v691_v38  ;;  %v764_v4 = vadd.f32 %v763_v37, %v760_v2  ;;  %v767_v11 = vmul.f32 %v766_v20, %v2453_v26  ;;  %v644_v34 = vadd.f32 %v643_v7, %v641_v10  ;;  %s2540_s23 = sld [smem:[#allocation2 + $0x67]]  ;;  %s3201_s16 = sld [smem:[#allocation59_spill]] }
  0xc2   : > { %v671_v12 = vadd.f32 %v670_v35, %v668_v27  ;;  %v722_v3 = vadd.f32 %v2153_v16, %v718_v40  ;;  %v745_v43 = vadd.f32 %v2183_v41, %v741_v53  ;;  %v3200_v50 = vstv %s3194_s7  ;;  %s2552_s10 = sld [smem:[#allocation2 + $0x68]]  ;;  %s3204_s12 = sld [smem:[#allocation47_spill]] }
  0xc3   : > { %v698_v20 = vadd.f32 %v3200_v50, %v695_v56  ;;  %v768_v2 = vadd.f32 %v767_v11, %v764_v4  ;;  %v3202_v55 = vstv %s3195_s6  ;;  %s2554_s1 = sld [smem:[#allocation2 + $0x69]]  ;;  %1566 = vtanh.f32 %v644_v34  ;;  %s2562_s7 = sld [smem:[#allocation2 + $0x6a]] }
  0xc4   : > { %v790_v8 = vmul.f32 %v3202_v55, %v2449_v13  ;;  %v749_v41 = vadd.f32 %v2192_v44, %v745_v43  ;;  %s2564_s6 = sld [smem:[#allocation2 + $0x6b]]  ;;  %1568 = vtanh.f32 %v671_v12  ;;  %s2573_s26 = sld [smem:[#allocation2 + $0x6d]]  ;;  %v2577_v44 = vmul.f32 %v2453_v26, %v2353_v39 }
  0xc5   : > { %v3203_v14 = vstv %s3196_s0  ;;  %v3205_v35 = vstv %s3197_s20  ;;  %v772_v19 = vadd.f32 %v2223_v25, %v768_v2  ;;  %s2571_s0 = sld [smem:[#allocation2 + $0x6c]]  ;;  %s3208_s20 = sld [smem:[#allocation51_spill]]  ;;  %1570 = vtanh.f32 %v698_v20 }
  0xc6   : > { %3199 = sst [smem:[#allocation48_spill]] %s2542_s25  ;;  %v794_v7 = vmul.f32 %v3203_v14, %v2453_v26  ;;  %v725_v16 = vadd.f32 %v3205_v35, %v722_v3  ;;  %v3206_v6 = vstv %s3198_s29  ;;  %v791_v22 = vadd.f32 %v790_v8, %v2455_v17  ;;  %s2582_s29 = sld [smem:[#allocation2 + $0x6e]] }
  0xc7   : > { %v817_v42 = vmul.f32 %v3206_v6, %v2449_v13  ;;  %v3207_v58 = vstv %s3201_s16  ;;  %s2584_s16 = sld [smem:[#allocation2 + $0x6f]]  ;;  %v2588_v52 = vmul.f32 %v2449_v13, %v2353_v39  ;;  %v776_v51 = vadd.f32 %v2235_v33, %v772_v19  ;;  %s2601_s5 = sld [smem:[#allocation2 + $0x70]] }
  0xc8   : > { %v821_v46 = vmul.f32 %v3207_v58, %v2453_v26  ;;  %v3209_v63 = vstv %s3204_s12  ;;  %1572 = vtanh.f32 %v725_v16  ;;  %v795_v21 = vadd.f32 %v794_v7, %v791_v22  ;;  %s3212_s12 = sld [smem:[#allocation55_spill]]  ;;  %s3213_s27 = sld [smem:[#allocation60_spill]] }
  0xc9   : > { %v752_v25 = vadd.f32 %v3209_v63, %v749_v41  ;;  %v818_v17 = vadd.f32 %v817_v42, %v2481_v36  ;;  %v2593_v62 = vmul.f32 %v2453_v26, %v2349_v23  ;;  %v1011_v9 = vstv %s2503_s17  ;;  %s3230_s28 = sld [smem:[#allocation80_spill]]  ;;  %s3232_s18 = sld [smem:[#allocation81_spill]] }
  0xca   : > { %v799_v39 = vadd.f32 %v2255_v60, %v795_v21  ;;  %v1014_v13 = vstv %s2511_s11  ;;  %v1018_v33 = vstv %s2513_s4  ;;  %v1022_v26 = vstv %s2518_s21  ;;  %s2780_s11 = sld [smem:[#allocation2 + $0x74]]  ;;  %s2791_s4 = sld [smem:[#allocation2 + $0x75]] }
  0xcb   : > { %1574 = vtanh.f32 %v752_v25  ;;  %v822_v36 = vadd.f32 %v821_v46, %v818_v17  ;;  %v3211_v0 = vstv %s3208_s20  ;;  %v1026_v30 = vstv %s2520_s3  ;;  %s3216_s20 = sld [smem:[#allocation67_spill]]  ;;  %s2830_s3 = sld [smem:[#allocation2 + $0x82]] }
  0xcc   : > { %v779_v18 = vadd.f32 %v3211_v0, %v776_v51  ;;  %v1030_v38 = vstv %s2530_s22  ;;  %v803_v60 = vadd.f32 %v2264_v47, %v799_v39  ;;  %v1034_v37 = vstv %s2532_s14  ;;  %s2810_s22 = sld [smem:[#allocation2 + $0x76]]  ;;  %s2818_s14 = sld [smem:[#allocation2 + $0x77]] }
  0xcd   : > { %3210 = sst [smem:[#allocation52_spill]] %s2584_s16  ;;  %v826_v23 = vadd.f32 %v2274_v31, %v822_v36  ;;  %v1038_v10 = vstv %s2540_s23  ;;  %v1042_v40 = vstv %s2542_s25  ;;  %v1046_v53 = vstv %s2552_s10  ;;  %v2619_v3 = vpop.eup %1566  ;;  %s3220_s25 = sld [smem:[#allocation62_spill]] }
  0xce   : > { %1576 = vtanh.f32 %v779_v18  ;;  %v1049_v31 = vstv %s2554_s1  ;;  %v3214_v56 = vstv %s3212_s12  ;;  %v1053_v11 = vstv %s2562_s7  ;;  %v2626_v2 = vpop.eup %1568  ;;  %s3218_s12 = sld [smem:[#allocation61_spill]]  ;;  %s2820_s1 = sld [smem:[#allocation2 + $0x80]] }
  0xcf   : > { %v830_v27 = vadd.f32 %v2277_v32, %v826_v23  ;;  %v806_v4 = vadd.f32 %v3214_v56, %v803_v60  ;;  %v1057_v34 = vstv %s2564_s6  ;;  %v1061_v12 = vstv %s2571_s0  ;;  %v2637_v35 = vpop.eup %1570  ;;  %s2828_s23 = sld [smem:[#allocation2 + $0x81]]  ;;  %s2836_s10 = sld [smem:[#allocation2 + $0x7e]] }
  0xd0   : > { %v3215_v47 = vstv %s3213_s27  ;;  %v1065_v32 = vstv %s2573_s26  ;;  %v1069_v50 = vstv %s2582_s29  ;;  %v1073_v20 = vstv %s2584_s16  ;;  %s3219_s27 = sld [smem:[#allocation68_spill]]  ;;  %s3222_s16 = sld [smem:[#allocation74_spill]] }
  0xd1   : > { %v833_v43 = vadd.f32 %v3215_v47, %v830_v27  ;;  %1578 = vtanh.f32 %v806_v4  ;;  %v3217_v55 = vstv %s2171_s15  ;;  %v872_v14 = vmul.f32 %v2619_v3, %v871_v49  ;;  %s3226_s15 = sld [smem:[#allocation69_spill]]  ;;  %s2841_s26 = sld [smem:[#allocation2 + $0x83]] }
  0xd2   : > { %v837_v8 = vmul.f32 %v2619_v3, %v3217_v55  ;;  %v907_v7 = vmul.f32 %v2619_v3, %v906_v28  ;;  %v3221_v16 = vstv %s2176_s13  ;;  %v3223_v6 = vstv %s2213_s24  ;;  %v2648_v49 = vpop.eup %1572  ;;  %s3229_s24 = sld [smem:[#allocation75_spill]]  ;;  %s3237_s13 = sld [smem:[#allocation70_spill]] }
  0xd3   : > { %1580 = vtanh.f32 %v833_v43  ;;  %v840_v41 = vmul.f32 %v2626_v2, %v3221_v16  ;;  %v875_v42 = vmul.f32 %v2626_v2, %v3223_v6  ;;  %v3224_v19 = vstv %s2259_s8  ;;  %s3239_s8 = sld [smem:[#allocation76_spill]]  ;;  %s2851_s7 = sld [smem:[#allocation2 + $0x7f]] }
  0xd4   : > { %v910_v22 = vmul.f32 %v2626_v2, %v3224_v19  ;;  %v3225_v58 = vstv %s2178_s19  ;;  %v3227_v46 = vstv %s3216_s20  ;;  %v3228_v25 = vstv %s2261_s30  ;;  %s3235_s19 = sld [smem:[#allocation63_spill]]  ;;  %s3241_s30 = sld [smem:[#allocation82_spill]] }
  0xd5   : > { %v844_v28 = vmul.f32 %v2637_v35, %v3225_v58  ;;  %v879_v63 = vmul.f32 %v2637_v35, %v3227_v46  ;;  %v914_v17 = vmul.f32 %v2637_v35, %v3228_v25  ;;  %v1081_v51 = vstv %s2601_s5  ;;  %v2660_v21 = vpop.eup %1574  ;;  %s2854_s6 = sld [smem:[#allocation2 + $0x84]]  ;;  %s2856_s0 = sld [smem:[#allocation2 + $0x88]] }
  0xd6   : > { %v841_v36 = vadd.f32 %v840_v41, %v837_v8  ;;  %v3231_v0 = vstv %s3218_s12  ;;  %v876_v39 = vadd.f32 %v875_v42, %v872_v14  ;;  %v3233_v23 = vstv %s3219_s27  ;;  %s3252_s12 = sld [smem:[#allocation64_spill]]  ;;  %s3254_s27 = sld [smem:[#allocation71_spill]] }
  0xd7   : > { %v848_v18 = vmul.f32 %v2648_v49, %v3231_v0  ;;  %v883_v60 = vmul.f32 %v2648_v49, %v3233_v23  ;;  %v3234_v27 = vstv %s3220_s25  ;;  %v911_v4 = vadd.f32 %v910_v22, %v907_v7  ;;  %s3243_s25 = sld [smem:[#allocation83_spill]]  ;;  %s2903_s20 = sld [smem:[#allocation2 + $0x87]] }
  0xd8   : > { %v852_v56 = vmul.f32 %v2660_v21, %v3234_v27  ;;  %v3236_v47 = vstv %s3222_s16  ;;  %v3238_v55 = vstv %s2297_s2  ;;  %v845_v16 = vadd.f32 %v844_v28, %v841_v36  ;;  %v2683_v58 = vpop.eup %1576  ;;  %s2694_s2 = sld [smem:[#allocation2 + $0x71]]  ;;  %s3272_s16 = sld [smem:[#allocation73_spill]] }
  0xd9   : > { %v918_v43 = vmul.f32 %v2648_v49, %v3236_v47  ;;  %v942_v8 = vmul.f32 %v2619_v3, %v3238_v55  ;;  %v880_v41 = vadd.f32 %v879_v63, %v876_v39  ;;  %v3240_v6 = vstv %s3226_s15  ;;  %s3256_s15 = sld [smem:[#allocation65_spill]]  ;;  %s3288_s17 = sld [smem:[#allocation22_spill]] }
  0xda   : > { %v887_v14 = vmul.f32 %v2660_v21, %v3240_v6  ;;  %v3242_v42 = vstv %s2299_s9  ;;  %v915_v7 = vadd.f32 %v914_v17, %v911_v4  ;;  %v3244_v22 = vstv %s3229_s24  ;;  %s3257_s24 = sld [smem:[#allocation72_spill]]  ;;  %s3274_s9 = sld [smem:[#allocation79_spill]] }
  0xdb   : > { %v945_v19 = vmul.f32 %v2626_v2, %v3242_v42  ;;  %v922_v46 = vmul.f32 %v2660_v21, %v3244_v22  ;;  %v3246_v25 = vstv %s3230_s28  ;;  %v3247_v28 = vstv %s3232_s18  ;;  %s3259_s28 = sld [smem:[#allocation77_spill]]  ;;  %s3260_s18 = sld [smem:[#allocation78_spill]] }
  0xdc   : > { %v949_v0 = vmul.f32 %v2637_v35, %v3246_v25  ;;  %v953_v63 = vmul.f32 %v2648_v49, %v3247_v28  ;;  %v849_v36 = vadd.f32 %v848_v18, %v845_v16  ;;  %v3249_v39 = vstv %s3235_s19  ;;  %s2874_s19 = sld [smem:[#allocation2 + $0x8c]]  ;;  %s3291_s21 = sld [smem:[#allocation88_spill]] }
  0xdd   : > { %v856_v23 = vmul.f32 %v2683_v58, %v3249_v39  ;;  %v884_v27 = vadd.f32 %v883_v60, %v880_v41  ;;  %v3251_v17 = vstv %s3237_s13  ;;  %v919_v47 = vadd.f32 %v918_v43, %v915_v7  ;;  %v2714_v43 = vpop.eup %1578  ;;  %s3265_s13 = sld [smem:[#allocation84_spill]] }
  0xde   : > { %v891_v4 = vmul.f32 %v2683_v58, %v3251_v17  ;;  %v3253_v55 = vstv %s3239_s8  ;;  %v946_v42 = vadd.f32 %v945_v19, %v942_v8  ;;  %v3255_v22 = vstv %s3241_s30  ;;  %s3267_s8 = sld [smem:[#allocation85_spill]] }
  0xdf   : > { %v926_v6 = vmul.f32 %v2683_v58, %v3253_v55  ;;  %v957_v25 = vmul.f32 %v2660_v21, %v3255_v22  ;;  %v853_v18 = vadd.f32 %v852_v56, %v849_v36  ;;  %v888_v16 = vadd.f32 %v887_v14, %v884_v27  ;;  %v2722_v56 = vpop.eup %1580  ;;  %s3286_s30 = sld [smem:[#allocation21_spill]] }
  0xe0   : > { %v3258_v28 = vstv %s3243_s25  ;;  %v977_v41 = vmul.f32 %v2619_v3, %v976_v61  ;;  %v923_v7 = vadd.f32 %v922_v46, %v919_v47  ;;  %v950_v39 = vadd.f32 %v949_v0, %v946_v42  ;;  %s3270_s25 = sld [smem:[#allocation66_spill]] }
  0xe1   : > { %v961_v60 = vmul.f32 %v2683_v58, %v3258_v28  ;;  %v980_v8 = vmul.f32 %v2626_v2, %v979_v5  ;;  %v984_v19 = vmul.f32 %v2637_v35, %v983_v59  ;;  %v857_v14 = vadd.f32 %v856_v23, %v853_v18 }
  0xe2   : > { %v3262_v36 = vstv %s3252_s12  ;;  %v892_v61 = vadd.f32 %v891_v4, %v888_v16  ;;  %v3263_v17 = vstv %s3254_s27  ;;  %v3264_v46 = vstv %s3256_s15  ;;  %s2770_s27 = sld [smem:[#allocation2 + $0x72]]  ;;  %s2778_s15 = sld [smem:[#allocation2 + $0x73]] }
  0xe3   : > { %v860_v27 = vmul.f32 %v2714_v43, %v3262_v36  ;;  %v895_v55 = vmul.f32 %v2714_v43, %v3263_v17  ;;  %v864_v0 = vmul.f32 %v2722_v56, %v3264_v46  ;;  %v3266_v5 = vstv %s3257_s24  ;;  %s2863_s24 = sld [smem:[#allocation2 + $0x89]]  ;;  %s2906_s12 = sld [smem:[#allocation2 + $0x90]] }
  0xe4   : > { %v899_v47 = vmul.f32 %v2722_v56, %v3266_v5  ;;  %v927_v59 = vadd.f32 %v926_v6, %v923_v7  ;;  %v3268_v42 = vstv %s3259_s28  ;;  %v3271_v4 = vstv %s3260_s18  ;;  %s2865_s28 = sld [smem:[#allocation2 + $0x8a]]  ;;  %s2872_s18 = sld [smem:[#allocation2 + $0x8b]] }
  0xe5   : > { %v930_v22 = vmul.f32 %v2714_v43, %v3268_v42  ;;  %v861_v23 = vadd.f32 %v860_v27, %v857_v14  ;;  %v896_v18 = vadd.f32 %v895_v55, %v892_v61  ;;  %v934_v16 = vmul.f32 %v2722_v56, %v3271_v4 }
  0xe6   : > { %v954_v28 = vadd.f32 %v953_v63, %v950_v39  ;;  %v981_v17 = vadd.f32 %v980_v8, %v977_v41  ;;  %v988_v46 = vmul.f32 %v2648_v49, %v987_v45  ;;  %v1084_v6 = vstv %s2694_s2  ;;  %s1471_s2 = sld [smem:[#allocation2 + $0x91]] }
  0xe7   : > { %v931_v36 = vadd.f32 %v930_v22, %v927_v59  ;;  %v865_v7 = vadd.f32 %v864_v0, %v861_v23  ;;  %v900_v5 = vadd.f32 %v899_v47, %v896_v18  ;;  %v3275_v27 = vstv %s3265_s13  ;;  %s2880_s13 = sld [smem:[#allocation2 + $0x85]] }
  0xe8   : > { %v958_v14 = vadd.f32 %v957_v25, %v954_v28  ;;  %v965_v61 = vmul.f32 %v2714_v43, %v3275_v27  ;;  %v3277_v42 = vstv %s3267_s8  ;;  %v985_v39 = vadd.f32 %v984_v19, %v981_v17  ;;  %s2883_s8 = sld [smem:[#allocation2 + $0x8d]] }
  0xe9   : > { %v935_v55 = vadd.f32 %v934_v16, %v931_v36  ;;  %v969_v63 = vmul.f32 %v2722_v56, %v3277_v42  ;;  %v992_v41 = vmul.f32 %v2660_v21, %v991_v15  ;;  %v3278_v45 = vstv %s3270_s25  ;;  %s2894_s25 = sld [smem:[#allocation2 + $0x86]] }
  0xea   : > { %v868_v8 = vadd.f32 %v3278_v45, %v865_v7  ;;  %v3279_v59 = vstv %s3272_s16  ;;  %v962_v0 = vadd.f32 %v961_v60, %v958_v14  ;;  %v996_v25 = vmul.f32 %v2683_v58, %v995_v24  ;;  %s2898_s16 = sld [smem:[#allocation2 + $0x8e]] }
  0xeb   : > { %v903_v22 = vadd.f32 %v3279_v59, %v900_v5  ;;  %v3280_v47 = vstv %s3274_s9  ;;  %v989_v18 = vadd.f32 %v988_v46, %v985_v39  ;;  %v1012_v4 = vmul.f32 %v2619_v3, %v1011_v9  ;;  %s1470_s9 = sld [smem:[#allocation2 + $0x8f]] }
  0xec   : > { %v938_v23 = vadd.f32 %v3280_v47, %v935_v55  ;;  %v1015_v15 = vmul.f32 %v2626_v2, %v1014_v13  ;;  %1582 = vtanh.f32 %v868_v8  ;;  %v966_v19 = vadd.f32 %v965_v61, %v962_v0 }
  0xed   : > { %v1000_v60 = vmul.f32 %v2714_v43, %v999_v54  ;;  %v1019_v24 = vmul.f32 %v2637_v35, %v1018_v33  ;;  %1584 = vtanh.f32 %v903_v22  ;;  %v993_v9 = vadd.f32 %v992_v41, %v989_v18 }
  0xee   : > { %v1016_v13 = vadd.f32 %v1015_v15, %v1012_v4  ;;  %v1023_v16 = vmul.f32 %v2648_v49, %v1022_v26  ;;  %1586 = vtanh.f32 %v938_v23  ;;  %v970_v54 = vadd.f32 %v969_v63, %v966_v19 }
  0xef   : > { %v1004_v33 = vmul.f32 %v2722_v56, %v1003_v1  ;;  %v1027_v28 = vmul.f32 %v2660_v21, %v1026_v30  ;;  %v997_v36 = vadd.f32 %v996_v25, %v993_v9  ;;  %v1031_v46 = vmul.f32 %v2683_v58, %v1030_v38 }
  0xf0   : > { %v1020_v17 = vadd.f32 %v1019_v24, %v1016_v13  ;;  %v1047_v26 = vmul.f32 %v2619_v3, %v1046_v53  ;;  %v973_v7 = vadd.f32 %v972_v57, %v970_v54  ;;  %v1035_v1 = vmul.f32 %v2714_v43, %v1034_v37 }
  0xf1   : > { %v1050_v30 = vmul.f32 %v2626_v2, %v1049_v31  ;;  %v1054_v5 = vmul.f32 %v2637_v35, %v1053_v11  ;;  %v1001_v14 = vadd.f32 %v1000_v60, %v997_v36  ;;  %v1039_v27 = vmul.f32 %v2722_v56, %v1038_v10 }
  0xf2   : > { %v1024_v38 = vadd.f32 %v1023_v16, %v1020_v17  ;;  %v1058_v57 = vmul.f32 %v2648_v49, %v1057_v34  ;;  %1588 = vtanh.f32 %v973_v7  ;;  %v1062_v53 = vmul.f32 %v2660_v21, %v1061_v12 }
  0xf3   : > { %v1051_v37 = vadd.f32 %v1050_v30, %v1047_v26  ;;  %v1066_v31 = vmul.f32 %v2683_v58, %v1065_v32  ;;  %v1005_v10 = vadd.f32 %v1004_v33, %v1001_v14  ;;  %v1082_v34 = vmul.f32 %v2619_v3, %v1081_v51 }
  0xf4   : > { %v1028_v11 = vadd.f32 %v1027_v28, %v1024_v38  ;;  %v1085_v61 = vmul.f32 %v2626_v2, %v1084_v6  ;;  %v1088_v12 = vstv %s2770_s27  ;;  %v1092_v42 = vstv %s2778_s15  ;;  %s3287_s27 = sld [smem:[#allocation15_spill]]  ;;  %s3289_s15 = sld [smem:[#allocation20_spill]] }
  0xf5   : > { %v1055_v55 = vadd.f32 %v1054_v5, %v1051_v37  ;;  %v1096_v63 = vstv %s2780_s11  ;;  %v1008_v32 = vadd.f32 %v1007_v29, %v1005_v10  ;;  %v1089_v45 = vmul.f32 %v2637_v35, %v1088_v12  ;;  %v1310_v12 = vld [vmem:[%s3286_s30 + $0x28] sm:$0xff] }
  0xf6   : > { %v1032_v39 = vadd.f32 %v1031_v46, %v1028_v11  ;;  %v1086_v41 = vadd.f32 %v1085_v61, %v1082_v34  ;;  %v1583_v8 = vpop.eup %1582  ;;  %v1070_v2 = vmul.f32 %v2714_v43, %v1069_v50  ;;  %v1093_v51 = vmul.f32 %v2648_v49, %v1092_v42 }
  0xf7   : > { %v1059_v3 = vadd.f32 %v1058_v57, %v1055_v55  ;;  %v1100_v6 = vstv %s2791_s4  ;;  %v1585_v59 = vpop.eup %1584  ;;  %1590 = vtanh.f32 %v1008_v32  ;;  %v1097_v35 = vmul.f32 %v2660_v21, %v1096_v63  ;;  %v1309_v55 = vld [vmem:[%s3286_s30 + $0x20] sm:$0xff]  ;;  %s3290_s4 = sld [smem:[#allocation18_spill]] }
  0xf8   : > { %v1036_v29 = vadd.f32 %v1035_v1, %v1032_v39  ;;  %v1090_v22 = vadd.f32 %v1089_v45, %v1086_v41  ;;  %v1587_v50 = vpop.eup %1586  ;;  %v1074_v49 = vmul.f32 %v2722_v56, %v1073_v20  ;;  %v1101_v25 = vmul.f32 %v2683_v58, %v1100_v6 }
  0xf9   : > { %v1063_v0 = vadd.f32 %v1062_v53, %v1059_v3  ;;  %v1104_v47 = vstv %s2810_s22  ;;  %v1108_v4 = vstv %s2818_s14  ;;  %v1116_v19 = vstv %s2820_s1  ;;  %s1205_s22 = sshll.u32 %s3288_s17, 4  ;;  %s2919_s22 = int_to_ptr.vmem [resolvable:$true] %s1205_s22 }
  0xfa   : > { %v1040_v21 = vadd.f32 %v1039_v27, %v1036_v29  ;;  %v1094_v23 = vadd.f32 %v1093_v51, %v1090_v22  ;;  %v1105_v18 = vmul.f32 %v2714_v43, %v1104_v47  ;;  %v1119_v60 = vstv %s2828_s23  ;;  %s1476_s11 = sshll.u32 %s3287_s27, 7 }
  0xfb   : > { %v1067_v15 = vadd.f32 %v1066_v31, %v1063_v0  ;;  %v1123_v24 = vstv %s2830_s3  ;;  %v1117_v9 = vmul.f32 %v1583_v8, %v1116_v19  ;;  %v1120_v13 = vmul.f32 %v1585_v59, %v1119_v60  ;;  %s2917_s23 = scalar_lea.hbm %s3291_s21, %s1476_s11  ;;  %s1193_s3 = scalar_lea.sflag [#allocation4], %s3289_s15 }
  0xfc   : > { %v1043_v20 = vadd.f32 %v1042_v40, %v1040_v21  ;;  %v1098_v58 = vadd.f32 %v1097_v35, %v1094_v23  ;;  %v1589_v16 = vpop.eup %1588  ;;  %v1077_v43 = vstv %s2836_s10  ;;  %v1124_v33 = vmul.f32 %v1587_v50, %v1123_v24  ;;  %s1641_s10 = scalar_lea.vmem %s2919_s22, 512 }
  0xfd   : > { %v1071_v54 = vadd.f32 %v1070_v2, %v1067_v15  ;;  %v1127_v28 = vstv %s2841_s26  ;;  %v1109_v17 = vmul.f32 %v2722_v56, %v1108_v4  ;;  %v1121_v40 = vadd.f32 %v1120_v13, %v1117_v9  ;;  %p1642_p12 = scmp.ne.s32.totalorder %s2919_s22, %s1641_s10  ;;  %p3292_p13 = scmp.ne.s32.totalorder %s3290_s4, 0 }
  0xfe   : > { %1592 = vtanh.f32 %v1043_v20  ;;  %v1102_v36 = vadd.f32 %v1101_v25, %v1098_v58  ;;  %v605_v46 = vadd.f32 %v2577_v44, %v2524_v48  ;;  %v1112_v7 = vstv %s2851_s7  ;;  %s1724_s26 = smov [#allocation7]  }
  0xff   : > { %v1075_v26 = vadd.f32 %v1074_v49, %v1071_v54  ;;  %v1128_v1 = vmul.f32 %v1589_v16, %v1127_v28  ;;  %v1125_v5 = vadd.f32 %v1124_v33, %v1121_v40  ;;  %v1131_v14 = vstv %s2854_s6  ;;  %p1643_p0 = pnand %p1642_p12, %p3292_p13  ;;  %s1645_s5 = sshll.u32 %s1724_s26, 4  ;;  %s1646_s5 = int_to_ptr.vmem [resolvable:$false] %s1645_s5 }
 0x100   : > { %v1106_v30 = vadd.f32 %v1105_v18, %v1102_v36  ;;  %v1150_v38 = vstv %s2856_s0  ;;  %v1153_v56 = vstv %s2863_s24  ;;  %v1157_v37 = vstv %s2865_s28  ;;  %s1647_s7 = scalar_lea.vmem %s1646_s5, 1024  ;;  %p1648_p10 = scmp.lt.s32.totalorder %s2919_s22, %s1646_s5 }
 0x101   : > { %v1078_v27 = vadd.f32 %v1077_v43, %v1075_v26  ;;  %v1151_v57 = vmul.f32 %v1583_v8, %v1150_v38  ;;  %v1591_v53 = vpop.eup %1590  ;;  %v608_v31 = vsub.f32 %v2588_v52, %v2593_v62  ;;  %v1154_v44 = vmul.f32 %v1585_v59, %v1153_v56  ;;  %p1644_p3 = pneg %p1643_p0  ;;  %p1649_p5 = scmp.lt.s32.totalorder %s1647_s7, %s1641_s10 }
 0x102   : > { %v1110_v48 = vadd.f32 %v1109_v17, %v1106_v30  ;;  %v1158_v10 = vmul.f32 %v1587_v50, %v1157_v37  ;;  %v1129_v11 = vadd.f32 %v1128_v1, %v1125_v5  ;;  %v1161_v34 = vstv %s2872_s18 }
 0x103   : > { %1594 = vtanh.f32 %v1078_v27  ;;  %v1165_v61 = vstv %s2874_s19  ;;  %v1132_v63 = vmul.f32 %v1591_v53, %v1131_v14  ;;  %v1155_v32 = vadd.f32 %v1154_v44, %v1151_v57  ;;  %p1650_p1 = por %p1649_p5, %p1648_p10 }
 0x104   : > { %v1113_v42 = vadd.f32 %v1112_v7, %v1110_v48  ;;  %v1162_v39 = vmul.f32 %v1589_v16, %v1161_v34  ;;  %v1135_v52 = vstv %s2880_s13  ;;  %v1166_v41 = vmul.f32 %v1591_v53, %v1165_v61 }
 0x105   : > { %v1159_v62 = vadd.f32 %v1158_v10, %v1155_v32  ;;  %v1169_v45 = vstv %s2883_s8  ;;  %v614_v8 = vmul.f32 %v1309_v55, %v605_v46  ;;  %v615_v3 = vmul.f32 %v1310_v12, %v608_v31  ;;  %p1651_p6 = pnand %p1650_p1, %p1644_p3 }
 0x106   : > { %1596 = vtanh.f32 %v1113_v42  ;;  %v1133_v51 = vadd.f32 %v1132_v63, %v1129_v11  ;;  %v610_v35 = vmul.f32 0.25, %v605_v46  ;;  %v1139_v0 = vstv %s2894_s25 }
 0x107   : > { %v1163_v6 = vadd.f32 %v1162_v39, %v1159_v62  ;;  %v616_v50 = vsub.f32 %v614_v8, %v615_v3  ;;  %v1173_v49 = vstv %s2898_s16  ;;  %v1143_v18 = vstv %s2903_s20 }
 0x108   : > { %v1593_v2 = vpop.eup %1592  ;;  %v1177_v15 = vstv %s1470_s9  ;;  %v609_v19 = vmul.f32 0.5, %v1309_v55  ;;  %v611_v60 = vmul.f32 %v1310_v12, %v610_v35  ;;  %v613_v24 = vmul.f32 0.5, %v1310_v12 }
 0x109   : > { %v1136_v59 = vmul.f32 %v1593_v2, %v1135_v52  ;;  %v1170_v29 = vmul.f32 %v1593_v2, %v1169_v45  ;;  %v1167_v22 = vadd.f32 %v1166_v41, %v1163_v6  ;;  %v617_v20 = vmul.f32 0.25, %v616_v50 }
 0x10a   : > { %v1147_v43 = vstv %s2906_s12  ;;  %v1181_v33 = vstv %s1471_s2  ;;  %v612_v28 = vadd.f32 %v611_v60, %v609_v19 }
 0x10b   : > { %v1137_v25 = vadd.f32 %v1136_v59, %v1133_v51  ;;  %v1171_v47 = vadd.f32 %v1170_v29, %v1167_v22  ;;  %v618_v36 = vadd.f32 %v617_v20, %v613_v24 }
 0x10d   : > { %v1595_v21 = vpop.eup %1594 }
 0x10e   : > { %v1140_v23 = vmul.f32 %v1595_v21, %v1139_v0  ;;  %v1174_v4 = vmul.f32 %v1595_v21, %v1173_v49 }
 0x110   : > { %v1597_v58 = vpop.eup %1596  ;;  %v1141_v9 = vadd.f32 %v1140_v23, %v1137_v25  ;;  %v1175_v13 = vadd.f32 %v1174_v4, %v1171_v47 }
 0x111   : > { %v1144_v16 = vmul.f32 %v1597_v58, %v1143_v18  ;;  %v1178_v54 = vmul.f32 %v1597_v58, %v1177_v15 }
 0x113   : > { %v1145_v17 = vadd.f32 %v1144_v16, %v1141_v9  ;;  %v1179_v40 = vadd.f32 %v1178_v54, %v1175_v13 }
 0x115   : > { %v1148_v46 = vadd.f32 %v1147_v43, %v1145_v17  ;;  %v1182_v26 = vadd.f32 %v1181_v33, %v1179_v40 }
 0x117   : > { %v1184_v7 = vadd.f32 %v1148_v46, %v612_v28  ;;  %v1189_v1 = vadd.f32 %v1182_v26, %v618_v36 }
 0x119   : > { %1472 = vst [vmem:[%s3288_s17 + $0x8] sm:$0xff] %v1184_v7  ;;  %1474 = vst [vmem:[%s3288_s17 + $0x18] sm:$0xff] %v1189_v1 }
 0x11a   : > { %1654 = shalt.err (!%p1651_p6)
}
 0x11b   : > { %s1655_s6 = scalar_lea.hbm %s2917_s23, 512  ;;  %s1659_s24 = scalar_lea.hbm %s3291_s21, 2048 }
 0x11c   : > { %p1656_p7 = scmp.ne.s32.totalorder %s2917_s23, %s1655_s6  ;;  %p1660_p4 = scmp.lt.u32.totalorder %s2917_s23, %s3291_s21 }
 0x11d   : > { %p1661_p2 = scmp.lt.u32.totalorder %s1659_s24, %s1655_s6  ;;  %p1663_p12 = scmp.lt.u32.totalorder %s1655_s6, %s2917_s23 }
 0x11e   : > { %p1657_p8 = pnand %p1656_p7, %p3292_p13 }
 0x11f   : > { %p1662_p11 = por %p1661_p2, %p1660_p4 }
 0x120   : > { %p1658_p9 = pneg %p1657_p8 }
 0x121   : > { %p1664_p0 = por %p1663_p12, %p1662_p11 }
 0x123   : > { %p1665_p3 = pnand %p1664_p0, %p1658_p9 }
 0x125   : > { %1668 = shalt.err (!%p1665_p3)
}
 0x126   : > { %s1725_s19 = smov 128   ;;  %s1726_s13 = smov 512  }
 0x127   : > { %s1727_s8 = smov 8  }
 0x128   : > { %1495 = dma.vmem_to_hbm [thread:$0]  (%p3292_p13), %s2919_s22, 512, %s2917_s23, %s1193_s3, %s1725_s19, %s1726_s13, %s1727_s8  }
 0x129 PF: > { %s3293_s30 = sld [smem:[#allocation14_spill]]  ;;  %s3294_s25 = sld [smem:[#allocation11_spill]] }
 0x12a   : > { %s3295_s16 = sld [smem:[#allocation19_spill]] }
 0x12f   : > { %p1512_p10 = scmp.ge.s32.totalorder %s3293_s30, 2  ;;  %s1220_s20 = sand.u32 1, %s3294_s25  }
 0x130   : > { %p3296_p5 = scmp.ne.s32.totalorder %s3295_s16, 0  ;;  %s1221_s9 = scalar_lea.sflag [#allocation4], %s1220_s20 }
 0x132   : > { %p1506_p1 = pnand %p1512_p10, %p3296_p5 }
 0x134   : > { %1694 = dma.done.wait (!%p1506_p1), %s1221_s9, 512  }
 0x135   : > { %1696 = vsyncadd (!%p1506_p1), %s1221_s9, 4294966784  ;;  %s3297_s12 = sld [smem:[#allocation16_spill]]  ;;  %s3298_s9 = sld [smem:[#allocation12_spill]] }
 0x136   : > { %s3299_s10 = sld [smem:[#allocation13_spill]]  ;;  %s3300_s11 = sld [smem:[#allocation17_spill]] }
 0x13b   : > { %p16_p6 = scmp.ge.s32.totalorder %s3297_s12, 6  }
 0x13d   :  { %18 = sbr.rel (!%p16_p6) target bundleno = 10 (0xa), region = 86 }
 0x144   :  { %1226 = vsyncpa [#allocation3], 1 }
 0x145   :  { %1228 = vsyncpa [#allocation3 + $0x1], 1 }
 0x146   :  { %1229 = vsyncpa [#allocation4], 1 }
 0x147   :  { %1231 = vsyncpa [#allocation4 + $0x1], 1 }
 0x148   :  { %1232 = vsyncpa [#allocation5], 1 }
 0x149   :  { %1234 = vsyncpa [#allocation5 + $0x1], 1 }

</bundles_post_ra>
